<compile_context>
chip_gen: v6e
topology: v6e:2x2x1
jax: 0.10.0
libtpu: 0.0.40
codegen_flags: <defaults>
</compile_context>

<pallas_src>
import math
import functools

import jax
import jax.numpy as jnp
from jax import lax
from jax.experimental import pallas as pl
from jax.experimental.pallas import tpu as pltpu


# ----------------------------- Pallas kernel -----------------------------

def _attention_kernel(x_ref, wqkv_ref, wo_ref, cos_ref, snl_ref, snr_ref,
                      o_ref, attn_scratch, *, n_heads, head_dim):
    """Fused QKV + RoPE + per-head softmax attention + WO for one batch row."""
    D = n_heads * head_dim
    hh = head_dim // 2

    # Fused QKV projection: one MXU pass over the bf16 activation slab.
    qkv = jnp.dot(x_ref[0], wqkv_ref[...],
                  preferred_element_type=jnp.float32)            # (S, 3D) f32
    q = qkv[:, 0:D]            # per-head [even|odd] layout, 1/sqrt(hd) folded in
    k = qkv[:, D:2 * D]        # per-head [even|odd] layout
    v = qkv[:, 2 * D:3 * D]    # original layout

    cos = cos_ref[...]         # (S, D): [ cos | cos ] per head block
    snl = snl_ref[...]         # (S, D): [-sin |  0  ] per head block
    snr = snr_ref[...]         # (S, D): [  0  | sin ] per head block

    def rope(t):
        # Within-head half-swap built from two full-slab lane rotations
        # (static slices + concat, unambiguous semantics); the wrap columns
        # are zeroed by the snl/snr tables.  Fully vectorized, no per-head ops.
        left = jnp.concatenate([t[:, hh:], t[:, :hh]], axis=1)            # t[p+hh]
        right = jnp.concatenate([t[:, D - hh:], t[:, :D - hh]], axis=1)   # t[p-hh]
        return t * cos + left * snl + right * snr

    q_rot = rope(q).astype(jnp.bfloat16)     # (S, D), per-head [re | ro]
    k_rot = rope(k).astype(jnp.bfloat16)
    v_b = v.astype(jnp.bfloat16)

    dn = (((1,), (1,)), ((), ()))   # contract last dims: q @ k^T, no transpose
    for h in range(n_heads):        # independent chains; LLO scheduler overlaps
        cols = slice(h * head_dim, (h + 1) * head_dim)   # contiguous 64-lane block
        s = lax.dot_general(q_rot[:, cols], k_rot[:, cols], dn,
                            preferred_element_type=jnp.float32)   # (S, S) f32
        s = s - jnp.max(s, axis=-1, keepdims=True)
        p = jnp.exp(s)
        p = p * pl.reciprocal(jnp.sum(p, axis=-1, keepdims=True),
                              approx=True)                        # EUP slot
        pv = jnp.dot(p.astype(jnp.bfloat16), v_b[:, cols],
                     preferred_element_type=jnp.float32)          # (S, hd)
        attn_scratch[:, cols] = pv           # direct write into VMEM f32 slab

    # Output projection as the epilogue: single K=D dot (best MXU shape).
    out = jnp.dot(attn_scratch[...].astype(jnp.bfloat16), wo_ref[...],
                  preferred_element_type=jnp.float32)             # (S, D)
    o_ref[0] = out.astype(o_ref.dtype)


def attention_pallas(x_bf16, wqkv, wo_t, cos_tab, snl_tab, snr_tab, *,
                     n_heads, head_dim):
    B, S, D = x_bf16.shape
    kernel = functools.partial(_attention_kernel, n_heads=n_heads,
                               head_dim=head_dim)
    # Explicit VMEM budget sized from the resident set (weights + tables +
    # activation/out blocks + scratch), with double-buffer/compile headroom.
    resident = ((wqkv.size + wo_t.size) * 2        # bf16 weights
                + 3 * S * D * 4                    # RoPE tables (f32)
                + S * D * 2                        # x block (bf16)
                + S * D * 4                        # out block (f32)
                + S * D * 4)                       # attn scratch (f32)
    vmem_limit = int(min(max(4 * resident + (2 << 20), 32 << 20), 100 << 20))
    return pl.pallas_call(
        kernel,
        grid=(B,),
        in_specs=[
            pl.BlockSpec((1, S, D), lambda b: (b, 0, 0)),
            pl.BlockSpec((D, 3 * D), lambda b: (0, 0)),   # constant block index
            pl.BlockSpec((D, D), lambda b: (0, 0)),
            pl.BlockSpec((S, D), lambda b: (0, 0)),
            pl.BlockSpec((S, D), lambda b: (0, 0)),
            pl.BlockSpec((S, D), lambda b: (0, 0)),
        ],
        out_specs=pl.BlockSpec((1, S, D), lambda b: (b, 0, 0)),
        out_shape=jax.ShapeDtypeStruct((B, S, D), jnp.float32),
        scratch_shapes=[pltpu.VMEM((S, D), jnp.float32)],
        compiler_params=pltpu.CompilerParams(
            dimension_semantics=("parallel",),
            vmem_limit_bytes=vmem_limit),
    )(x_bf16, wqkv, wo_t, cos_tab, snl_tab, snr_tab)


# ----------------------- one-time init-side preparation -----------------------

def _per_head_even_odd(w_t, n_heads, head_dim):
    """Permute output columns to head-major [even | odd] blocks."""
    d_in, d_out = w_t.shape
    w4 = w_t.reshape(d_in, n_heads, head_dim // 2, 2)
    w_p = jnp.concatenate([w4[..., 0], w4[..., 1]], axis=-1)   # (d_in, nh, hd)
    return w_p.reshape(d_in, d_out)


def prepare_attention_params(wq, wk, wv, wo, freqs_cos, freqs_sin, *, n_heads):
    """One-time (model-init) weight fusion + RoPE table construction.

    torch nn.Linear weights are (out, in) with y = x @ W.T.  Returns:
      wqkv  (D, 3D) bf16 : [q | k | v] with q/k output columns permuted to a
                           per-head [even | odd] order and 1/sqrt(head_dim)
                           folded into the q columns (scores stay invariant
                           because q and k share the permutation).
      wo_t  (D, D)  bf16 : wo transposed.
      cos/snl/snr (max_seq, D) f32 RoPE tables matching that layout.
    """
    D = wq.shape[0]
    head_dim = D // n_heads
    assert D % 128 == 0 and head_dim % 2 == 0
    scale = 1.0 / math.sqrt(head_dim)
    wq_p = _per_head_even_odd(wq.T, n_heads, head_dim) * scale
    wk_p = _per_head_even_odd(wk.T, n_heads, head_dim)
    wqkv = jnp.concatenate([wq_p, wk_p, wv.T], axis=1).astype(jnp.bfloat16)
    wo_t = wo.T.astype(jnp.bfloat16)

    zeros = jnp.zeros_like(freqs_sin)
    cos_tab = jnp.tile(jnp.concatenate([freqs_cos, freqs_cos], axis=1),
                       (1, n_heads)).astype(jnp.float32)
    snl_tab = jnp.tile(jnp.concatenate([-freqs_sin, zeros], axis=1),
                       (1, n_heads)).astype(jnp.float32)
    snr_tab = jnp.tile(jnp.concatenate([zeros, freqs_sin], axis=1),
                       (1, n_heads)).astype(jnp.float32)
    return wqkv, wo_t, cos_tab, snl_tab, snr_tab


def precompute_freqs(head_dim, end, theta=10000.0):
    freqs = 1.0 / theta ** (jnp.arange(0, head_dim, 2)[: head_dim // 2]
                            .astype(jnp.float32) / head_dim)
    t = jnp.arange(end, dtype=jnp.float32)
    ang = jnp.outer(t, freqs)          # (end, head_dim // 2)
    return jnp.cos(ang), jnp.sin(ang)  # polar(1, ang) = cos + i*sin


# ----------------------------- forward (jitted path) -----------------------------

def attention_forward(x, start_pos, params, mask=None, *, n_heads):
    """Pallas equivalent of torchbench llama Attention.forward.

    `mask` is accepted for signature parity but (exactly like the quoted
    reference) is never applied to the scores.
    """
    del mask
    if start_pos != 0:
        # TODO(synk): KV-cache writeback / start_pos>0 prefix not modeled; with
        # start_pos=0 the zero-initialized cache slice equals the current k/v.
        raise NotImplementedError("start_pos > 0 (KV-cache prefix) unsupported")
    wqkv, wo_t, cos_tab, snl_tab, snr_tab = params
    B, S, D = x.shape
    head_dim = D // n_heads
    assert S % 8 == 0
    cos = cos_tab[start_pos:start_pos + S]
    snl = snl_tab[start_pos:start_pos + S]
    snr = snr_tab[start_pos:start_pos + S]
    # bf16 activations: halve the HBM->VMEM DMA and drop the in-kernel cast.
    return attention_pallas(x.astype(jnp.bfloat16), wqkv, wo_t, cos, snl, snr,
                            n_heads=n_heads, head_dim=head_dim)


# ----------------------------- pure-JAX reference -----------------------------

def reference_forward(x, wq, wk, wv, wo, start_pos, cos, sin, n_heads):
    B, S, D = x.shape
    Dh = D // n_heads
    xq = (x @ wq.T).reshape(B, S, n_heads, Dh)
    xk = (x @ wk.T).reshape(B, S, n_heads, Dh)
    xv = (x @ wv.T).reshape(B, S, n_heads, Dh)
    c = cos[start_pos:start_pos + S][None, :, None, :]
    s = sin[start_pos:start_pos + S][None, :, None, :]

    def rope(t):
        te, to = t[..., 0::2], t[..., 1::2]
        re = te * c - to * s
        ro = te * s + to * c
        return jnp.stack([re, ro], axis=-1).reshape(t.shape)

    q = rope(xq).transpose(0, 2, 1, 3)
    k = rope(xk).transpose(0, 2, 1, 3)
    v = xv.transpose(0, 2, 1, 3)
    sc = jnp.einsum("bhqd,bhkd->bhqk", q, k) / math.sqrt(Dh)
    p = jax.nn.softmax(sc, axis=-1)
    o = jnp.einsum("bhqk,bhkd->bhqd", p, v)
    o = o.transpose(0, 2, 1, 3).reshape(B, S, D)
    return o @ wo.T


# ----------------------------- main -----------------------------

if __name__ == "__main__":
    # small ModelArgs-consistent configuration
    DIM = 256
    N_HEADS = 4
    HEAD_DIM = DIM // N_HEADS
    BATCH = 2            # >= 2 parallel grid steps so both v7x TCs get work
    SEQ = 16
    MAX_SEQ_LEN = 32
    START_POS = 0

    key = jax.random.PRNGKey(0)
    kx, kq, kk, kv, ko = jax.random.split(key, 5)
    x = jax.random.normal(kx, (BATCH, SEQ, DIM), dtype=jnp.float32)
    winit = lambda k: (jax.random.normal(k, (DIM, DIM), dtype=jnp.float32)
                       / math.sqrt(DIM))
    wq, wk, wv, wo = winit(kq), winit(kk), winit(kv), winit(ko)

    freqs_cos, freqs_sin = precompute_freqs(HEAD_DIM, MAX_SEQ_LEN)

    # ---- one-time init: fused bf16 weights + RoPE tables (hoisted out of the
    # jitted forward path; no per-call weight prep / HBM round trips).
    params = prepare_attention_params(wq, wk, wv, wo, freqs_cos, freqs_sin,
                                      n_heads=N_HEADS)
    params = jax.tree_util.tree_map(jax.block_until_ready, params)

    fwd = jax.jit(functools.partial(attention_forward, n_heads=N_HEADS),
                  static_argnums=(1,))
    out = fwd(x, START_POS, params)
    jax.block_until_ready(out)
    assert out.shape == (BATCH, SEQ, DIM) and out.dtype == jnp.float32

    # correctness check vs f32 pure-JAX reference (tolerance covers the bf16
    # MXU operands + approximate reciprocal).
    ref = reference_forward(x, wq, wk, wv, wo, START_POS, freqs_cos,
                            freqs_sin, N_HEADS)
    max_err = float(jnp.max(jnp.abs(out - ref)))
    rel = max_err / (float(jnp.max(jnp.abs(ref))) + 1e-6)
    assert rel < 8e-2, f"max abs err {max_err} (rel {rel})"
    print("KERNEL_OK")
</pallas_src>

<mosaic_0001>
module attributes {stable_mosaic.version = 11 : i64} {
  func.func @_attention_kernel(%arg0: i32, %arg1: memref<1x16x256xbf16, #tpu.memory_space<vmem>>, %arg2: memref<256x768xbf16, #tpu.memory_space<vmem>>, %arg3: memref<256x256xbf16, #tpu.memory_space<vmem>>, %arg4: memref<16x256xf32, #tpu.memory_space<vmem>>, %arg5: memref<16x256xf32, #tpu.memory_space<vmem>>, %arg6: memref<16x256xf32, #tpu.memory_space<vmem>>, %arg7: memref<1x16x256xf32, #tpu.memory_space<vmem>>, %arg8: memref<16x256xf32, #tpu.memory_space<vmem>>) attributes {dimension_semantics = [#tpu.dimension_semantics<parallel>], iteration_bounds = array<i64: 2>, scalar_prefetch = 0 : i64, scratch_operands = 1 : i64, tpu.core_type = #tpu.core_type<tc>, window_params = [{transform_indices = @transform_0, window_bounds = array<i64: 1, 16, 256>}, {pipeline_mode = #tpu.pipeline_mode<synchronous>, transform_indices = @transform_1, window_bounds = array<i64: 256, 768>}, {pipeline_mode = #tpu.pipeline_mode<synchronous>, transform_indices = @transform_2, window_bounds = array<i64: 256, 256>}, {pipeline_mode = #tpu.pipeline_mode<synchronous>, transform_indices = @transform_3, window_bounds = array<i64: 16, 256>}, {pipeline_mode = #tpu.pipeline_mode<synchronous>, transform_indices = @transform_4, window_bounds = array<i64: 16, 256>}, {pipeline_mode = #tpu.pipeline_mode<synchronous>, transform_indices = @transform_5, window_bounds = array<i64: 16, 256>}, {transform_indices = @transform_6, window_bounds = array<i64: 1, 16, 256>}]} {
    %c0 = arith.constant 0 : index
    %c0_0 = arith.constant 0 : index
    %c0_1 = arith.constant 0 : index
    %0 = vector.load %arg1[%c0, %c0_0, %c0_1] : memref<1x16x256xbf16, #tpu.memory_space<vmem>>, vector<1x16x256xbf16>
    %1 = vector.shape_cast %0 : vector<1x16x256xbf16> to vector<16x256xbf16>
    %c0_2 = arith.constant 0 : index
    %c0_3 = arith.constant 0 : index
    %2 = vector.load %arg2[%c0_2, %c0_3] : memref<256x768xbf16, #tpu.memory_space<vmem>>, vector<256x768xbf16>
    %cst = arith.constant dense<0.000000e+00> : vector<16x768xf32>
    %3 = tpu.matmul %1, %2, %cst {dimension_numbers = #tpu.dot_dimension_numbers<[1], [0], [0], [1], [0, 0, 1, 1], [], []>} : vector<16x256xbf16>, vector<256x768xbf16>, vector<16x768xf32> -> vector<16x768xf32>
    %4 = vector.extract_strided_slice %3 {offsets = [0, 0], sizes = [16, 256], strides = [1, 1]} : vector<16x768xf32> to vector<16x256xf32>
    %5 = vector.extract_strided_slice %3 {offsets = [0, 256], sizes = [16, 256], strides = [1, 1]} : vector<16x768xf32> to vector<16x256xf32>
    %6 = vector.extract_strided_slice %3 {offsets = [0, 512], sizes = [16, 256], strides = [1, 1]} : vector<16x768xf32> to vector<16x256xf32>
    %c0_4 = arith.constant 0 : index
    %c0_5 = arith.constant 0 : index
    %7 = vector.load %arg4[%c0_4, %c0_5] : memref<16x256xf32, #tpu.memory_space<vmem>>, vector<16x256xf32>
    %c0_6 = arith.constant 0 : index
    %c0_7 = arith.constant 0 : index
    %8 = vector.load %arg5[%c0_6, %c0_7] : memref<16x256xf32, #tpu.memory_space<vmem>>, vector<16x256xf32>
    %c0_8 = arith.constant 0 : index
    %c0_9 = arith.constant 0 : index
    %9 = vector.load %arg6[%c0_8, %c0_9] : memref<16x256xf32, #tpu.memory_space<vmem>>, vector<16x256xf32>
    %10 = vector.extract_strided_slice %4 {offsets = [0, 32], sizes = [16, 224], strides = [1, 1]} : vector<16x256xf32> to vector<16x224xf32>
    %11 = vector.extract_strided_slice %4 {offsets = [0, 0], sizes = [16, 32], strides = [1, 1]} : vector<16x256xf32> to vector<16x32xf32>
    %12 = tpu.concatenate %10, %11 in 1 : vector<16x224xf32>, vector<16x32xf32> -> vector<16x256xf32>
    %13 = vector.extract_strided_slice %4 {offsets = [0, 224], sizes = [16, 32], strides = [1, 1]} : vector<16x256xf32> to vector<16x32xf32>
    %14 = vector.extract_strided_slice %4 {offsets = [0, 0], sizes = [16, 224], strides = [1, 1]} : vector<16x256xf32> to vector<16x224xf32>
    %15 = tpu.concatenate %13, %14 in 1 : vector<16x32xf32>, vector<16x224xf32> -> vector<16x256xf32>
    %16 = arith.mulf %4, %7 : vector<16x256xf32>
    %17 = arith.mulf %12, %8 : vector<16x256xf32>
    %18 = arith.addf %16, %17 : vector<16x256xf32>
    %19 = arith.mulf %15, %9 : vector<16x256xf32>
    %20 = arith.addf %18, %19 : vector<16x256xf32>
    %21 = arith.truncf %20 : vector<16x256xf32> to vector<16x256xbf16>
    %22 = vector.extract_strided_slice %5 {offsets = [0, 32], sizes = [16, 224], strides = [1, 1]} : vector<16x256xf32> to vector<16x224xf32>
    %23 = vector.extract_strided_slice %5 {offsets = [0, 0], sizes = [16, 32], strides = [1, 1]} : vector<16x256xf32> to vector<16x32xf32>
    %24 = tpu.concatenate %22, %23 in 1 : vector<16x224xf32>, vector<16x32xf32> -> vector<16x256xf32>
    %25 = vector.extract_strided_slice %5 {offsets = [0, 224], sizes = [16, 32], strides = [1, 1]} : vector<16x256xf32> to vector<16x32xf32>
    %26 = vector.extract_strided_slice %5 {offsets = [0, 0], sizes = [16, 224], strides = [1, 1]} : vector<16x256xf32> to vector<16x224xf32>
    %27 = tpu.concatenate %25, %26 in 1 : vector<16x32xf32>, vector<16x224xf32> -> vector<16x256xf32>
    %28 = arith.mulf %5, %7 : vector<16x256xf32>
    %29 = arith.mulf %24, %8 : vector<16x256xf32>
    %30 = arith.addf %28, %29 : vector<16x256xf32>
    %31 = arith.mulf %27, %9 : vector<16x256xf32>
    %32 = arith.addf %30, %31 : vector<16x256xf32>
    %33 = arith.truncf %32 : vector<16x256xf32> to vector<16x256xbf16>
    %34 = arith.truncf %6 : vector<16x256xf32> to vector<16x256xbf16>
    %35 = vector.extract_strided_slice %21 {offsets = [0, 0], sizes = [16, 64], strides = [1, 1]} : vector<16x256xbf16> to vector<16x64xbf16>
    %36 = vector.extract_strided_slice %33 {offsets = [0, 0], sizes = [16, 64], strides = [1, 1]} : vector<16x256xbf16> to vector<16x64xbf16>
    %cst_10 = arith.constant dense<0.000000e+00> : vector<16x16xf32>
    %37 = tpu.matmul %35, %36, %cst_10 {dimension_numbers = #tpu.dot_dimension_numbers<[1], [1], [0], [0], [0, 0, 1, 0], [], []>} : vector<16x64xbf16>, vector<16x64xbf16>, vector<16x16xf32> -> vector<16x16xf32>
    %cst_11 = arith.constant dense<0xFF800000> : vector<16xf32>
    %38 = vector.multi_reduction <maximumf>, %37, %cst_11 [1] : vector<16x16xf32> to vector<16xf32>
    %39 = vector.shape_cast %38 : vector<16xf32> to vector<16x1xf32>
    %40 = vector.broadcast %39 : vector<16x1xf32> to vector<16x16xf32>
    %41 = arith.subf %37, %40 : vector<16x16xf32>
    %42 = math.exp %41 : vector<16x16xf32>
    %cst_12 = arith.constant dense<0.000000e+00> : vector<16xf32>
    %43 = vector.multi_reduction <add>, %42, %cst_12 [1] : vector<16x16xf32> to vector<16xf32>
    %44 = vector.shape_cast %43 : vector<16xf32> to vector<16x1xf32>
    %45 = tpu.reciprocal %44 {approx = true} : vector<16x1xf32> -> vector<16x1xf32>
    %46 = vector.broadcast %45 : vector<16x1xf32> to vector<16x16xf32>
    %47 = arith.mulf %42, %46 : vector<16x16xf32>
    %48 = arith.truncf %47 : vector<16x16xf32> to vector<16x16xbf16>
    %49 = vector.extract_strided_slice %34 {offsets = [0, 0], sizes = [16, 64], strides = [1, 1]} : vector<16x256xbf16> to vector<16x64xbf16>
    %cst_13 = arith.constant dense<0.000000e+00> : vector<16x64xf32>
    %50 = tpu.matmul %48, %49, %cst_13 {dimension_numbers = #tpu.dot_dimension_numbers<[1], [0], [0], [1], [0, 0, 1, 1], [], []>} : vector<16x16xbf16>, vector<16x64xbf16>, vector<16x64xf32> -> vector<16x64xf32>
    %c0_14 = arith.constant 0 : index
    %c0_15 = arith.constant 0 : index
    %51 = vector.load %arg8[%c0_14, %c0_15] : memref<16x256xf32, #tpu.memory_space<vmem>>, vector<16x64xf32>
    tpu.vector_store %arg8[%c0_14, %c0_15], %50 {strides = array<i32>} : memref<16x256xf32, #tpu.memory_space<vmem>>, vector<16x64xf32>,
    %52 = vector.extract_strided_slice %21 {offsets = [0, 64], sizes = [16, 64], strides = [1, 1]} : vector<16x256xbf16> to vector<16x64xbf16>
    %53 = vector.extract_strided_slice %33 {offsets = [0, 64], sizes = [16, 64], strides = [1, 1]} : vector<16x256xbf16> to vector<16x64xbf16>
    %cst_16 = arith.constant dense<0.000000e+00> : vector<16x16xf32>
    %54 = tpu.matmul %52, %53, %cst_16 {dimension_numbers = #tpu.dot_dimension_numbers<[1], [1], [0], [0], [0, 0, 1, 0], [], []>} : vector<16x64xbf16>, vector<16x64xbf16>, vector<16x16xf32> -> vector<16x16xf32>
    %cst_17 = arith.constant dense<0xFF800000> : vector<16xf32>
    %55 = vector.multi_reduction <maximumf>, %54, %cst_17 [1] : vector<16x16xf32> to vector<16xf32>
    %56 = vector.shape_cast %55 : vector<16xf32> to vector<16x1xf32>
    %57 = vector.broadcast %56 : vector<16x1xf32> to vector<16x16xf32>
    %58 = arith.subf %54, %57 : vector<16x16xf32>
    %59 = math.exp %58 : vector<16x16xf32>
    %cst_18 = arith.constant dense<0.000000e+00> : vector<16xf32>
    %60 = vector.multi_reduction <add>, %59, %cst_18 [1] : vector<16x16xf32> to vector<16xf32>
    %61 = vector.shape_cast %60 : vector<16xf32> to vector<16x1xf32>
    %62 = tpu.reciprocal %61 {approx = true} : vector<16x1xf32> -> vector<16x1xf32>
    %63 = vector.broadcast %62 : vector<16x1xf32> to vector<16x16xf32>
    %64 = arith.mulf %59, %63 : vector<16x16xf32>
    %65 = arith.truncf %64 : vector<16x16xf32> to vector<16x16xbf16>
    %66 = vector.extract_strided_slice %34 {offsets = [0, 64], sizes = [16, 64], strides = [1, 1]} : vector<16x256xbf16> to vector<16x64xbf16>
    %cst_19 = arith.constant dense<0.000000e+00> : vector<16x64xf32>
    %67 = tpu.matmul %65, %66, %cst_19 {dimension_numbers = #tpu.dot_dimension_numbers<[1], [0], [0], [1], [0, 0, 1, 1], [], []>} : vector<16x16xbf16>, vector<16x64xbf16>, vector<16x64xf32> -> vector<16x64xf32>
    %c0_20 = arith.constant 0 : index
    %c64 = arith.constant 64 : index
    %68 = vector.load %arg8[%c0_20, %c64] : memref<16x256xf32, #tpu.memory_space<vmem>>, vector<16x64xf32>
    tpu.vector_store %arg8[%c0_20, %c64], %67 {strides = array<i32>} : memref<16x256xf32, #tpu.memory_space<vmem>>, vector<16x64xf32>,
    %69 = vector.extract_strided_slice %21 {offsets = [0, 128], sizes = [16, 64], strides = [1, 1]} : vector<16x256xbf16> to vector<16x64xbf16>
    %70 = vector.extract_strided_slice %33 {offsets = [0, 128], sizes = [16, 64], strides = [1, 1]} : vector<16x256xbf16> to vector<16x64xbf16>
    %cst_21 = arith.constant dense<0.000000e+00> : vector<16x16xf32>
    %71 = tpu.matmul %69, %70, %cst_21 {dimension_numbers = #tpu.dot_dimension_numbers<[1], [1], [0], [0], [0, 0, 1, 0], [], []>} : vector<16x64xbf16>, vector<16x64xbf16>, vector<16x16xf32> -> vector<16x16xf32>
    %cst_22 = arith.constant dense<0xFF800000> : vector<16xf32>
    %72 = vector.multi_reduction <maximumf>, %71, %cst_22 [1] : vector<16x16xf32> to vector<16xf32>
    %73 = vector.shape_cast %72 : vector<16xf32> to vector<16x1xf32>
    %74 = vector.broadcast %73 : vector<16x1xf32> to vector<16x16xf32>
    %75 = arith.subf %71, %74 : vector<16x16xf32>
    %76 = math.exp %75 : vector<16x16xf32>
    %cst_23 = arith.constant dense<0.000000e+00> : vector<16xf32>
    %77 = vector.multi_reduction <add>, %76, %cst_23 [1] : vector<16x16xf32> to vector<16xf32>
    %78 = vector.shape_cast %77 : vector<16xf32> to vector<16x1xf32>
    %79 = tpu.reciprocal %78 {approx = true} : vector<16x1xf32> -> vector<16x1xf32>
    %80 = vector.broadcast %79 : vector<16x1xf32> to vector<16x16xf32>
    %81 = arith.mulf %76, %80 : vector<16x16xf32>
    %82 = arith.truncf %81 : vector<16x16xf32> to vector<16x16xbf16>
    %83 = vector.extract_strided_slice %34 {offsets = [0, 128], sizes = [16, 64], strides = [1, 1]} : vector<16x256xbf16> to vector<16x64xbf16>
    %cst_24 = arith.constant dense<0.000000e+00> : vector<16x64xf32>
    %84 = tpu.matmul %82, %83, %cst_24 {dimension_numbers = #tpu.dot_dimension_numbers<[1], [0], [0], [1], [0, 0, 1, 1], [], []>} : vector<16x16xbf16>, vector<16x64xbf16>, vector<16x64xf32> -> vector<16x64xf32>
    %c0_25 = arith.constant 0 : index
    %c128 = arith.constant 128 : index
    %85 = vector.load %arg8[%c0_25, %c128] : memref<16x256xf32, #tpu.memory_space<vmem>>, vector<16x64xf32>
    tpu.vector_store %arg8[%c0_25, %c128], %84 {strides = array<i32>} : memref<16x256xf32, #tpu.memory_space<vmem>>, vector<16x64xf32>,
    %86 = vector.extract_strided_slice %21 {offsets = [0, 192], sizes = [16, 64], strides = [1, 1]} : vector<16x256xbf16> to vector<16x64xbf16>
    %87 = vector.extract_strided_slice %33 {offsets = [0, 192], sizes = [16, 64], strides = [1, 1]} : vector<16x256xbf16> to vector<16x64xbf16>
    %cst_26 = arith.constant dense<0.000000e+00> : vector<16x16xf32>
    %88 = tpu.matmul %86, %87, %cst_26 {dimension_numbers = #tpu.dot_dimension_numbers<[1], [1], [0], [0], [0, 0, 1, 0], [], []>} : vector<16x64xbf16>, vector<16x64xbf16>, vector<16x16xf32> -> vector<16x16xf32>
    %cst_27 = arith.constant dense<0xFF800000> : vector<16xf32>
    %89 = vector.multi_reduction <maximumf>, %88, %cst_27 [1] : vector<16x16xf32> to vector<16xf32>
    %90 = vector.shape_cast %89 : vector<16xf32> to vector<16x1xf32>
    %91 = vector.broadcast %90 : vector<16x1xf32> to vector<16x16xf32>
    %92 = arith.subf %88, %91 : vector<16x16xf32>
    %93 = math.exp %92 : vector<16x16xf32>
    %cst_28 = arith.constant dense<0.000000e+00> : vector<16xf32>
    %94 = vector.multi_reduction <add>, %93, %cst_28 [1] : vector<16x16xf32> to vector<16xf32>
    %95 = vector.shape_cast %94 : vector<16xf32> to vector<16x1xf32>
    %96 = tpu.reciprocal %95 {approx = true} : vector<16x1xf32> -> vector<16x1xf32>
    %97 = vector.broadcast %96 : vector<16x1xf32> to vector<16x16xf32>
    %98 = arith.mulf %93, %97 : vector<16x16xf32>
    %99 = arith.truncf %98 : vector<16x16xf32> to vector<16x16xbf16>
    %100 = vector.extract_strided_slice %34 {offsets = [0, 192], sizes = [16, 64], strides = [1, 1]} : vector<16x256xbf16> to vector<16x64xbf16>
    %cst_29 = arith.constant dense<0.000000e+00> : vector<16x64xf32>
    %101 = tpu.matmul %99, %100, %cst_29 {dimension_numbers = #tpu.dot_dimension_numbers<[1], [0], [0], [1], [0, 0, 1, 1], [], []>} : vector<16x16xbf16>, vector<16x64xbf16>, vector<16x64xf32> -> vector<16x64xf32>
    %c0_30 = arith.constant 0 : index
    %c192 = arith.constant 192 : index
    %102 = vector.load %arg8[%c0_30, %c192] : memref<16x256xf32, #tpu.memory_space<vmem>>, vector<16x64xf32>
    tpu.vector_store %arg8[%c0_30, %c192], %101 {strides = array<i32>} : memref<16x256xf32, #tpu.memory_space<vmem>>, vector<16x64xf32>,
    %c0_31 = arith.constant 0 : index
    %c0_32 = arith.constant 0 : index
    %103 = vector.load %arg8[%c0_31, %c0_32] : memref<16x256xf32, #tpu.memory_space<vmem>>, vector<16x256xf32>
    %104 = arith.truncf %103 : vector<16x256xf32> to vector<16x256xbf16>
    %c0_33 = arith.constant 0 : index
    %c0_34 = arith.constant 0 : index
    %105 = vector.load %arg3[%c0_33, %c0_34] : memref<256x256xbf16, #tpu.memory_space<vmem>>, vector<256x256xbf16>
    %cst_35 = arith.constant dense<0.000000e+00> : vector<16x256xf32>
    %106 = tpu.matmul %104, %105, %cst_35 {dimension_numbers = #tpu.dot_dimension_numbers<[1], [0], [0], [1], [0, 0, 1, 1], [], []>} : vector<16x256xbf16>, vector<256x256xbf16>, vector<16x256xf32> -> vector<16x256xf32>
    %c0_36 = arith.constant 0 : index
    %c0_37 = arith.constant 0 : index
    %c0_38 = arith.constant 0 : index
    %107 = vector.load %arg7[%c0_36, %c0_37, %c0_38] : memref<1x16x256xf32, #tpu.memory_space<vmem>>, vector<1x16x256xf32>
    %108 = vector.shape_cast %107 : vector<1x16x256xf32> to vector<16x256xf32>
    %109 = vector.shape_cast %106 : vector<16x256xf32> to vector<1x16x256xf32>
    tpu.vector_store %arg7[%c0_36, %c0_37, %c0_38], %109 {strides = array<i32>} : memref<1x16x256xf32, #tpu.memory_space<vmem>>, vector<1x16x256xf32>,
    return
  }
  func.func @transform_0(%arg0: i32) -> (i32, i32, i32) {
    %c0_i32 = arith.constant 0 : i32
    %c0_i32_0 = arith.constant 0 : i32
    %c0_i32_1 = arith.constant 0 : i32
    return %arg0, %c0_i32, %c0_i32_0 : i32, i32, i32
  }
  func.func @transform_1(%arg0: i32) -> (i32, i32) {
    %c0_i32 = arith.constant 0 : i32
    %c0_i32_0 = arith.constant 0 : i32
    %c0_i32_1 = arith.constant 0 : i32
    return %c0_i32, %c0_i32_0 : i32, i32
  }
  func.func @transform_2(%arg0: i32) -> (i32, i32) {
    %c0_i32 = arith.constant 0 : i32
    %c0_i32_0 = arith.constant 0 : i32
    %c0_i32_1 = arith.constant 0 : i32
    return %c0_i32, %c0_i32_0 : i32, i32
  }
  func.func @transform_3(%arg0: i32) -> (i32, i32) {
    %c0_i32 = arith.constant 0 : i32
    %c0_i32_0 = arith.constant 0 : i32
    %c0_i32_1 = arith.constant 0 : i32
    return %c0_i32, %c0_i32_0 : i32, i32
  }
  func.func @transform_4(%arg0: i32) -> (i32, i32) {
    %c0_i32 = arith.constant 0 : i32
    %c0_i32_0 = arith.constant 0 : i32
    %c0_i32_1 = arith.constant 0 : i32
    return %c0_i32, %c0_i32_0 : i32, i32
  }
  func.func @transform_5(%arg0: i32) -> (i32, i32) {
    %c0_i32 = arith.constant 0 : i32
    %c0_i32_0 = arith.constant 0 : i32
    %c0_i32_1 = arith.constant 0 : i32
    return %c0_i32, %c0_i32_0 : i32, i32
  }
  func.func @transform_6(%arg0: i32) -> (i32, i32, i32) {
    %c0_i32 = arith.constant 0 : i32
    %c0_i32_0 = arith.constant 0 : i32
    %c0_i32_1 = arith.constant 0 : i32
    return %arg0, %c0_i32, %c0_i32_0 : i32, i32, i32
  }
}

</mosaic_0001>

<bundles_post_ra>
// kernel: attention_forward.1
= control target key start
LH: loop header
LB: loop body
LE: loop exit
PB: predicated region body
PF: predicated region fallthrough
CT: control target
= control target key end

     0   :  { %11 = vsyncpa [#allocation4], 0  ;;  %s3000_s0 = inlined_call_operand.vmem [shape: bf16[2,16,256], index: 0, kind: input, shape index: {}]   ;;  %s3001_s1 = inlined_call_operand.hbm [shape: bf16[256,768], index: 1, kind: input, shape index: {}]   ;;  %s3002_s2 = inlined_call_operand.vmem [shape: bf16[256,256], index: 2, kind: input, shape index: {}]   ;;  %s3003_s3 = inlined_call_operand.vmem [shape: f32[16,256], index: 3, kind: input, shape index: {}]   ;;  %s3004_s4 = inlined_call_operand.vmem [shape: f32[16,256], index: 4, kind: input, shape index: {}]   ;;  %s3005_s5 = inlined_call_operand.vmem [shape: f32[16,256], index: 5, kind: input, shape index: {}]   ;;  %s3006_s6 = inlined_call_operand.hbm [shape: f32[2,16,256], index: 6, kind: output, shape index: {}]  }
   0x1   :  { %12 = vsyncpa [#allocation5], 0 }
   0x2   :  { %14 = vsyncpa [#allocation5 + $0x1], 0  ;;  %s2601_s21 = smov 0   ;;  %s2603_s22 = smov 0  }
   0x3   :  { %s2605_s23 = smov 0   ;;  %s2607_s24 = smov 0  }
   0x4 LB: > { %s2622_s25 = sadd.s32 4294967295, %s2553_s24   ;;  %s1959_s26 = sadd.s32 4294967294, %s2553_s24   ;;  %s2553_s24 = sphi %s2607_s24, %s3014_s24   ;;  %s2549_s23 = sphi %s2605_s23, %s3013_s23   ;;  %s2545_s22 = sphi %s2603_s22, %s3012_s22   ;;  %s2541_s21 = sphi %s2601_s21, %s3011_s21  }
   0x5   : > { %s2626_s27 = sadd.s32 1, %s2553_s24   ;;  %s158_s28 = sadd.s32 1, %s2549_s23 }
   0x6   : > { %s155_s29 = ssub.s32 %s2553_s24, %s2626_s27  ;;  %p168_p0 = scmp.ne.s32.totalorder %s2549_s23, %s2545_s22 }
   0x7   : > { %p156_p1 = scmp.eq.s32.totalorder %s155_s29, 0  ;;  %p169_p2 = scmp.eq.s32.totalorder %s2622_s25, 1 }
   0x8   : > { %p174_p3 = scmp.ne.s32.totalorder %s2545_s22, %s2541_s21  ;;  %p175_p4 = scmp.eq.s32.totalorder %s1959_s26, 1 }
   0x9   : > { %s2637_s30 = scalar_select %p156_p1, %s2549_s23, %s158_s28  }
   0xa   : > { %p2639_p5 = por %p169_p2, %p168_p0  ;;  %p2643_p6 = por %p175_p4, %p174_p3 }
   0xb   : > { %p1960_p7 = scmp.ge.s32.totalorder %s2553_s24, 1  ;;  %p182_p8 = scmp.lt.s32.totalorder %s2553_s24, 3 }
   0xc   : > { %s3008_s8 = scalar_select %p2643_p6, 1, 0 }
   0xd   : > { %p2191_p9 = scmp.eq.s32.totalorder %s2622_s25, 0  ;;  %p2650_p10 = pnand %p1960_p7, %p182_p8 }
   0xe   : > { %s2555_s10 = smov [#allocation3]  }
   0xf   : > { %s194_s11 = sshll.u32 %s2555_s10, 4  ;;  %p2183_p11 = pneg %p2650_p10  ;;  %s195_s11 = int_to_ptr.vmem [resolvable:$true] %s194_s11 }
  0x10   : > { %s2474_s12 = scalar_lea.vmem %s195_s11, 12288  ;;  %p2482_p3 = scmp.lt.s32.totalorder %s195_s11, %s195_s11 }
  0x11   : > { %p2184_p12 = pnand %p2191_p9, %p2183_p11  ;;  %p2475_p0 = scmp.ne.s32.totalorder %s195_s11, %s2474_s12 }
  0x12   : > { %p2483_p4 = scmp.lt.s32.totalorder %s2474_s12, %s2474_s12 }
  0x13   : > { %p2465_p13 = pneg %p2184_p12 }
  0x14   : > { %p2484_p6 = por %p2483_p4, %p2482_p3 }
  0x15   : > { %p2477_p1 = pnand %p2475_p0, %p2465_p13 }
  0x17   : > { %p2478_p2 = pneg %p2477_p1 }
  0x19   : > { %p2485_p7 = pnand %p2484_p6, %p2478_p2 }
  0x1b   : > { %2488 = shalt.err (!%p2485_p7)
}
  0x1c   : > { %s2556_s13 = smov 384   ;;  %s2557_s14 = smov 24  }
  0x1d   : > { %2186 = dma.hbm_to_vmem [thread:$0]  (!%p2184_p12), %s3001_s1, 12288, %s195_s11, [#allocation4], %s2556_s13, %s2556_s13, %s2557_s14  }
  0x1e   : > { %230 = sbr.rel (%p2650_p10) target bundleno = 3053 (0xbed), region = 44 }
  0x23   : > { %2532 = dma.done.wait (%p2191_p9), [#allocation4], 12288  }
  0x24   : > { %2534 = vsyncadd (%p2191_p9), [#allocation4], 4294955008  ;;  %v2236_v0 = vld [vmem:[#allocation3 + $0x154] ss:$24 sps:$4 sm:$0xff]   ;;  %v2240_v2 = vld [vmem:[#allocation3 + $0x150] ss:$24 sps:$4 sm:$0xff]  }
  0x25   : > { %v2238_v1 = vld [vmem:[#allocation3 + $0x15c] ss:$24 sps:$4 sm:$0xff]   ;;  %854 = vmatprep.subr.bf16.mxu0 %v2236_v0  ;;  %v2241_v3 = vld [vmem:[#allocation3 + $0x158] ss:$24 sps:$4 sm:$0xff]   ;;  %v2244_v5 = vld [vmem:[#allocation3 + $0x12c] ss:$24 sps:$4 sm:$0xff]  }
  0x26   : > { %897 = vmatprep.subr.bf16.mxu1 %v2238_v1  ;;  %v2242_v4 = vld [vmem:[#allocation3 + $0x124] ss:$24 sps:$4 sm:$0xff]   ;;  %855 = vmatpush1.bf16.msra.mxu0 %v2240_v2  ;;  %v2246_v6 = vld [vmem:[#allocation3 + $0x120] ss:$24 sps:$4 sm:$0xff]   ;;  %v2248_v8 = vld [vmem:[#allocation3 + $0xf4] ss:$24 sps:$4 sm:$0xff]  }
  0x27   : > { %898 = vmatpush1.bf16.msra.mxu1 %v2241_v3  ;;  %856 = vmatprep.subr.bf16.mxu0 %v2242_v4  ;;  %v2247_v7 = vld [vmem:[#allocation3 + $0x128] ss:$24 sps:$4 sm:$0xff]   ;;  %v2250_v9 = vld [vmem:[#allocation3 + $0xfc] ss:$24 sps:$4 sm:$0xff]   ;;  %v2253_v11 = vld [vmem:[#allocation3 + $0xf8] ss:$24 sps:$4 sm:$0xff]  }
  0x28   : > { %899 = vmatprep.subr.bf16.mxu1 %v2244_v5  ;;  %v2252_v10 = vld [vmem:[#allocation3 + $0xf0] ss:$24 sps:$4 sm:$0xff]   ;;  %v2254_v12 = vld [vmem:[#allocation3 + $0xc4] ss:$24 sps:$4 sm:$0xff]   ;;  %v2258_v14 = vld [vmem:[#allocation3 + $0xc0] ss:$24 sps:$4 sm:$0xff]  }
  0x29   : > { %v2256_v13 = vld [vmem:[#allocation3 + $0xcc] ss:$24 sps:$4 sm:$0xff]   ;;  %v2259_v15 = vld [vmem:[#allocation3 + $0xc8] ss:$24 sps:$4 sm:$0xff]   ;;  %v2262_v17 = vld [vmem:[#allocation3 + $0x9c] ss:$24 sps:$4 sm:$0xff]  }
  0x2a   : > { %857 = vmatpush1.bf16.msra.mxu0 %v2246_v6  ;;  %v2260_v16 = vld [vmem:[#allocation3 + $0x94] ss:$24 sps:$4 sm:$0xff]   ;;  %v2264_v18 = vld [vmem:[#allocation3 + $0x90] ss:$24 sps:$4 sm:$0xff]   ;;  %v2266_v20 = vld [vmem:[#allocation3 + $0x64] ss:$24 sps:$4 sm:$0xff]  }
  0x2b   : > { %900 = vmatpush1.bf16.msra.mxu1 %v2247_v7  ;;  %858 = vmatprep.subr.bf16.mxu0 %v2248_v8  ;;  %v2265_v19 = vld [vmem:[#allocation3 + $0x98] ss:$24 sps:$4 sm:$0xff]   ;;  %v2268_v21 = vld [vmem:[#allocation3 + $0x6c] ss:$24 sps:$4 sm:$0xff]   ;;  %v2271_v23 = vld [vmem:[#allocation3 + $0x68] ss:$24 sps:$4 sm:$0xff]  }
  0x2c   : > { %901 = vmatprep.subr.bf16.mxu1 %v2250_v9  ;;  %v2270_v22 = vld [vmem:[#allocation3 + $0x60] ss:$24 sps:$4 sm:$0xff]   ;;  %v2272_v24 = vld [vmem:[#allocation3 + $0x34] ss:$24 sps:$4 sm:$0xff]   ;;  %v2276_v26 = vld [vmem:[#allocation3 + $0x30] ss:$24 sps:$4 sm:$0xff]  }
  0x2d   : > { %v2274_v25 = vld [vmem:[#allocation3 + $0x3c] ss:$24 sps:$4 sm:$0xff]   ;;  %v2277_v27 = vld [vmem:[#allocation3 + $0x38] ss:$24 sps:$4 sm:$0xff]   ;;  %v2280_v29 = vld [vmem:[#allocation3 + $0xc] ss:$24 sps:$4 sm:$0xff]  }
  0x2e   : > { %859 = vmatpush1.bf16.msra.mxu0 %v2252_v10  ;;  %v2278_v28 = vld [vmem:[#allocation3 + $0x4] ss:$24 sps:$4 sm:$0xff]   ;;  %v2282_v30 = vld [vmem:[#allocation3] ss:$24 sps:$4 sm:$0xff]   ;;  %v2284_v32 = vld [vmem:[#allocation3 + $0x2d4] ss:$24 sps:$4 sm:$0xff]  }
  0x2f   : > { %902 = vmatpush1.bf16.msra.mxu1 %v2253_v11  ;;  %860 = vmatprep.subr.bf16.mxu0 %v2254_v12  ;;  %v2283_v31 = vld [vmem:[#allocation3 + $0x8] ss:$24 sps:$4 sm:$0xff]   ;;  %v2286_v33 = vld [vmem:[#allocation3 + $0x2dc] ss:$24 sps:$4 sm:$0xff]   ;;  %p260_p6 = scmp.lt.s32.totalorder %s2622_s25, 1  ;;  %s2558_s9 = smov 96  }
  0x30   : > { %903 = vmatprep.subr.bf16.mxu1 %v2256_v13  ;;  %v2288_v34 = vld [vmem:[#allocation3 + $0x2d0] ss:$24 sps:$4 sm:$0xff]   ;;  %v2290_v36 = vld [vmem:[#allocation3 + $0x2a4] ss:$24 sps:$4 sm:$0xff]   ;;  %v2294_v38 = vld [vmem:[#allocation3 + $0x2a0] ss:$24 sps:$4 sm:$0xff]  }
  0x31   : > { %v2289_v35 = vld [vmem:[#allocation3 + $0x2d8] ss:$24 sps:$4 sm:$0xff]   ;;  %v2292_v37 = vld [vmem:[#allocation3 + $0x2ac] ss:$24 sps:$4 sm:$0xff]   ;;  %s261_s17 = scalar_select %p260_p6, %s2622_s25, 1  ;;  %v2560_v9 = vmov 0.0  }
  0x32   : > { %861 = vmatpush1.bf16.msra.mxu0 %v2258_v14  ;;  %v2295_v39 = vld [vmem:[#allocation3 + $0x2a8] ss:$24 sps:$4 sm:$0xff]   ;;  %v2296_v40 = vld [vmem:[#allocation3 + $0x274] ss:$24 sps:$4 sm:$0xff]   ;;  %v2301_v43 = vld [vmem:[#allocation3 + $0x278] ss:$24 sps:$4 sm:$0xff]  }
  0x33   : > { %904 = vmatpush1.bf16.msra.mxu1 %v2259_v15  ;;  %862 = vmatprep.subr.bf16.mxu0 %v2260_v16  ;;  %v2298_v41 = vld [vmem:[#allocation3 + $0x27c] ss:$24 sps:$4 sm:$0xff]   ;;  %s2111_s18 = sshll.u32 %s261_s17, 4  ;;  %v2300_v42 = vld [vmem:[#allocation3 + $0x270] ss:$24 sps:$4 sm:$0xff]   ;;  %s2559_s10 = smov 32  }
  0x34   : > { %905 = vmatprep.subr.bf16.mxu1 %v2262_v17  ;;  %v2302_v44 = vld [vmem:[#allocation3 + $0x244] ss:$24 sps:$4 sm:$0xff]   ;;  %s2672_s26 = scalar_lea.vmem %s3000_s0, %s2111_s18  ;;  %v2306_v46 = vld [vmem:[#allocation3 + $0x240] ss:$24 sps:$4 sm:$0xff]   ;;  %v2308_v48 = vld [vmem:[#allocation3 + $0x214] ss:$24 sps:$4 sm:$0xff]  }
  0x35   : > { %v2304_v45 = vld [vmem:[#allocation3 + $0x24c] ss:$24 sps:$4 sm:$0xff]   ;;  %v2307_v47 = vld [vmem:[#allocation3 + $0x248] ss:$24 sps:$4 sm:$0xff]   ;;  %v2310_v49 = vld [vmem:[#allocation3 + $0x21c] ss:$24 sps:$4 sm:$0xff]  }
  0x36   : > { %863 = vmatpush1.bf16.msra.mxu0 %v2264_v18  ;;  %v2332_v50 = vld [vmem:[%s2672_s26 + $0x4] ss:$8 sps:$4 sm:$0xff]   ;;  %v2312_v51 = vld [vmem:[#allocation3 + $0x210] ss:$24 sps:$4 sm:$0xff]   ;;  %v2318_v55 = vld [vmem:[#allocation3 + $0x1e0] ss:$24 sps:$4 sm:$0xff]  }
  0x37   : > { %906 = vmatpush1.bf16.msra.mxu1 %v2265_v19  ;;  %864 = vmatprep.subr.bf16.mxu0 %v2266_v20  ;;  %v2313_v52 = vld [vmem:[#allocation3 + $0x218] ss:$24 sps:$4 sm:$0xff]   ;;  %v2314_v53 = vld [vmem:[#allocation3 + $0x1e4] ss:$24 sps:$4 sm:$0xff]   ;;  %v2319_v56 = vld [vmem:[#allocation3 + $0x1e8] ss:$24 sps:$4 sm:$0xff]  }
  0x38   : > { %907 = vmatprep.subr.bf16.mxu1 %v2268_v21  ;;  %886 = vmatprep.mubr.bf16.mxu0 %v2332_v50  ;;  %v2316_v54 = vld [vmem:[#allocation3 + $0x1ec] ss:$24 sps:$4 sm:$0xff]   ;;  %v2322_v58 = vld [vmem:[#allocation3 + $0x1bc] ss:$24 sps:$4 sm:$0xff]   ;;  %v2324_v59 = vld [vmem:[#allocation3 + $0x1b0] ss:$24 sps:$4 sm:$0xff]  }
  0x39   : > { %929 = vmatprep.mubr.bf16.mxu1 %v2332_v50  ;;  %v2320_v57 = vld [vmem:[#allocation3 + $0x1b4] ss:$24 sps:$4 sm:$0xff]   ;;  %v2325_v60 = vld [vmem:[#allocation3 + $0x1b8] ss:$24 sps:$4 sm:$0xff]   ;;  %v2326_v61 = vld [vmem:[#allocation3 + $0x184] ss:$24 sps:$4 sm:$0xff]  }
  0x3a   : > { %865 = vmatpush1.bf16.msra.mxu0 %v2270_v22  ;;  %v2328_v62 = vld [vmem:[#allocation3 + $0x18c] ss:$24 sps:$4 sm:$0xff]   ;;  %v2330_v63 = vld [vmem:[#allocation3 + $0x180] ss:$24 sps:$4 sm:$0xff]   ;;  %vm2561_vm0 = vmmov 0   ;;  %vm1007_vm1 = vcmask 785408  }
  0x3b   : > { %908 = vmatpush1.bf16.msra.mxu1 %v2271_v23  ;;  %866 = vmatprep.subr.bf16.mxu0 %v2272_v24  ;;  %v2331_v0 = vld [vmem:[#allocation3 + $0x188] ss:$24 sps:$4 sm:$0xff]   ;;  %vm1028_vm2 = vcmask 261120   ;;  %vm1123_vm3 = vcmask 523264   ;;  %vm1171_vm4 = vcmask 130048   ;;  %s2562_s18 = smov 64  }
  0x3c   : > { %909 = vmatprep.subr.bf16.mxu1 %v2274_v25  ;;  %v2676_v1 = vld [vmem:[%s2672_s26] ss:$8 sps:$4 sm:$0xff]   ;;  %vm1373_vm5 = vcmask 1048064   ;;  %s257_s12 = sand.u32 1, %s2545_s22   ;;  %s2112_s15 = sshll.u32 %s2622_s25, 9 }
  0x3d   : > { %v984_v4 = vld [vmem:[%s3003_s3 + $0x8] sm:$0xff]  ;;  %s2958_s19 = scalar_lea.hbm %s3006_s6, %s2112_s15  ;;  %s2960_s20 = scalar_lea.sflag [#allocation5], %s257_s12 }
  0x3e   : > { %867 = vmatpush1.bf16.msra.mxu0 %v2276_v26  ;;  %v988_v17 = vld [vmem:[%s3004_s4 + $0x8] sm:$0xff]  ;;  %v989_v26 = vld [vmem:[%s3004_s4 + $0x10] sm:$0xff]  ;;  %s2563_s25 = smov [#allocation6]  }
  0x3f   : > { %910 = vmatpush1.bf16.msra.mxu1 %v2277_v27  ;;  %868 = vmatprep.subr.bf16.mxu0 %v2278_v28  ;;  %v990_v27 = vld [vmem:[%s3004_s4 + $0x18] sm:$0xff]  ;;  %s2493_s28 = sshll.u32 %s2563_s25, 4  ;;  %s2494_s28 = int_to_ptr.vmem [resolvable:$false] %s2493_s28 }
  0x40   : > { %911 = vmatprep.subr.bf16.mxu1 %v2280_v29  ;;  %v985_v29 = vld [vmem:[%s3003_s3 + $0x10] sm:$0xff]  ;;  %s2495_s29 = scalar_lea.vmem %s2494_s28, 1024 }
  0x42   : > { %869 = vmatpush1.bf16.msra.mxu0 %v2282_v30  ;;  %v987_v30 = vld [vmem:[%s3004_s4] sm:$0xff] }
  0x43   : > { %912 = vmatpush1.bf16.msra.mxu1 %v2283_v31  ;;  %870 = vmatprep.subr.bf16.mxu0 %v2284_v32 }
  0x44   : > { %913 = vmatprep.subr.bf16.mxu1 %v2286_v33  ;;  %v986_v33 = vld [vmem:[%s3003_s3 + $0x18] sm:$0xff] }
  0x46   : > { %871 = vmatpush2.bf16.msra.mxu0 %v2288_v34 }
  0x47   : > { %914 = vmatpush2.bf16.msra.mxu1 %v2289_v35  ;;  %872 = vmatprep.subr.bf16.mxu0 %v2290_v36 }
  0x48   : > { %915 = vmatprep.subr.bf16.mxu1 %v2292_v37  ;;  %v991_v37 = vld [vmem:[%s3005_s5] sm:$0xff] }
  0x4a   : > { %873 = vmatpush2.bf16.msra.mxu0 %v2294_v38  ;;  %v992_v38 = vld [vmem:[%s3005_s5 + $0x8] sm:$0xff] }
  0x4b   : > { %916 = vmatpush2.bf16.msra.mxu1 %v2295_v39  ;;  %874 = vmatprep.subr.bf16.mxu0 %v2296_v40  ;;  %v983_v39 = vld [vmem:[%s3003_s3] sm:$0xff] }
  0x4c   : > { %917 = vmatprep.subr.bf16.mxu1 %v2298_v41 }
  0x4e   : > { %875 = vmatpush2.bf16.msra.mxu0 %v2300_v42 }
  0x4f   : > { %918 = vmatpush2.bf16.msra.mxu1 %v2301_v43  ;;  %876 = vmatprep.subr.bf16.mxu0 %v2302_v44 }
  0x50   : > { %919 = vmatprep.subr.bf16.mxu1 %v2304_v45 }
  0x52   : > { %877 = vmatpush2.bf16.msra.mxu0 %v2306_v46 }
  0x53   : > { %920 = vmatpush2.bf16.msra.mxu1 %v2307_v47  ;;  %878 = vmatprep.subr.bf16.mxu0 %v2308_v48  ;;  %v993_v48 = vld [vmem:[%s3005_s5 + $0x10] sm:$0xff] }
  0x54   : > { %921 = vmatprep.subr.bf16.mxu1 %v2310_v49  ;;  %v994_v49 = vld [vmem:[%s3005_s5 + $0x18] sm:$0xff] }
  0x56   : > { %879 = vmatpush2.bf16.msra.mxu0 %v2312_v51 }
  0x57   : > { %922 = vmatpush2.bf16.msra.mxu1 %v2313_v52  ;;  %880 = vmatprep.subr.bf16.mxu0 %v2314_v53 }
  0x58   : > { %923 = vmatprep.subr.bf16.mxu1 %v2316_v54 }
  0x5a   : > { %881 = vmatpush2.bf16.msra.mxu0 %v2318_v55 }
  0x5b   : > { %924 = vmatpush2.bf16.msra.mxu1 %v2319_v56  ;;  %882 = vmatprep.subr.bf16.mxu0 %v2320_v57 }
  0x5c   : > { %925 = vmatprep.subr.bf16.mxu1 %v2322_v58 }
  0x5e   : > { %883 = vmatpush2.bf16.msra.mxu0 %v2324_v59 }
  0x5f   : > { %926 = vmatpush2.bf16.msra.mxu1 %v2325_v60  ;;  %884 = vmatprep.subr.bf16.mxu0 %v2326_v61 }
  0x60   : > { %927 = vmatprep.subr.bf16.mxu1 %v2328_v62 }
  0x62   : > { %885 = vmatpush2.bf16.msra.mxu0 %v2330_v63 }
  0x63   : > { %928 = vmatpush2.bf16.msra.mxu1 %v2331_v0 }
  0x64   : > { %2129 = vmatprep.subr.bf16.mxu1 %v2560_v9 }
  0x65   : > { %887 = vmatmul.mubr.bf16.vlgmr.msra.gmra.mxu0 %v2676_v1 }
  0x66   : > { %930 = vmatmul.mubr.bf16.vlgmr.msra.gmra.mxu1 %v2676_v1  ;;  %972 = vmatprep.mubr.bf16.mxu0 %v2332_v50 }
  0x67   : > { %2131 = vmatprep.mubr.msk.bf16.mxu1 %vm2561_vm0, %v2560_v9 }
 0x125   : > { %v2680_v2 = vpop.f32.mrf.mxu0 }
 0x126   : > { %v2682_v3 = vpop.f32.mrf.mxu1 }
 0x127   : > { %1063 = vrot.lane.b32.xlu0 %v2682_v3, %s2558_s9  ;;  %v890_v5 = vpop.f32.mrf.mxu0  ;;  %v1099_v44 = vmul.f32 %v983_v39, %v2682_v3 }
 0x128   : > { %v933_v6 = vpop.f32.mrf.mxu1  ;;  %v1038_v7 = vmul.f32 %v984_v4, %v890_v5  ;;  %1001 = vrot.lane.b32.xlu1 %v890_v5, %s2558_s9 }
 0x129   : > { %v2691_v11 = vpop.f32.mrf.mxu0  ;;  %v1100_v28 = vmul.f32 %v984_v4, %v933_v6 }
 0x12a   : > { %v935_v8 = vpop.f32.mrf.mxu1 }
 0x12b   : > { %1087 = vrot.lane.b32.xlu0 %v2682_v3, %s2559_s10  ;;  %v2693_v12 = vpop.f32.mrf.mxu0  ;;  %v1101_v45 = vmul.f32 %v985_v29, %v935_v8 }
 0x12c   : > { %1067 = vrot.lane.b32.xlu1 %v935_v8, %s2558_s9  ;;  %v937_v10 = vpop.f32.mrf.mxu1 }
 0x12d   : > { %v1102_v50 = vmul.f32 %v986_v33, %v937_v10 }
 0x12f   : > { %999 = vrot.lane.b32.xlu0 %v2680_v2, %s2558_s9 }
 0x130   : > { %1089 = vrot.lane.b32.xlu1 %v935_v8, %s2559_s10 }
 0x133   : > { %1065 = vrot.lane.b32.xlu0 %v933_v6, %s2558_s9 }
 0x134   : > { %1069 = vrot.lane.b32.xlu1 %v937_v10, %s2558_s9 }
 0x137   : > { %1081 = vrot.lane.b32.xlu0 %v933_v6, %s2559_s10 }
 0x138   : > { %1083 = vrot.lane.b32.xlu1 %v937_v10, %s2559_s10 }
 0x13b   : > { %1018 = vrot.lane.b32.xlu0 %v890_v5, %s2559_s10 }
 0x13c   : > { %1005 = vrot.lane.b32.xlu1 %v2693_v12, %s2558_s9 }
 0x13f   : > { %1003 = vrot.lane.b32.xlu0 %v2691_v11, %s2558_s9 }
 0x140   : > { %1020 = vrot.lane.b32.xlu1 %v2693_v12, %s2559_s10 }
 0x143   : > { %1024 = vrot.lane.b32.xlu0 %v2680_v2, %s2559_s10 }
 0x144   : > { %1026 = vrot.lane.b32.xlu1 %v2691_v11, %s2559_s10 }
 0x199   : > { %v1064_v13 = vpop.permute.xlu0 %1063 }
 0x19a   : > { %v1002_v14 = vpop.permute.xlu1 %1001 }
 0x19d   : > { %v1088_v15 = vpop.permute.xlu0 %1087 }
 0x19e   : > { %v1068_v16 = vpop.permute.xlu1 %1067 }
 0x1a1   : > { %v1000_v18 = vpop.permute.xlu0 %999 }
 0x1a2   : > { %v1016_v19 = vsel %vm1007_vm1, %v1002_v14, %v1000_v18  ;;  %v1090_v21 = vpop.permute.xlu1 %1089  ;;  %v1008_v5 = vsel %vm1007_vm1, %v1000_v18, %v1002_v14 }
 0x1a3   : > { %v1042_v20 = vmul.f32 %v1016_v19, %v988_v17 }
 0x1a5   : > { %v2706_v22 = vadd.f32 %v1042_v20, %v1038_v7  ;;  %v1066_v23 = vpop.permute.xlu0 %1065  ;;  %v1041_v20 = vmul.f32 %v1008_v5, %v987_v30  ;;  %v2377_v5 = vld [vmem:[#allocation3 + $0x1c0] ss:$24 sps:$4 sm:$0xff]  }
 0x1a6   : > { %v1071_v24 = vsel %vm1007_vm1, %v1064_v13, %v1066_v23  ;;  %v1079_v25 = vsel %vm1007_vm1, %v1066_v23, %v1064_v13  ;;  %v1070_v32 = vpop.permute.xlu1 %1069  ;;  %v1037_v23 = vmul.f32 %v983_v39, %v2680_v2 }
 0x1a7   : > { %v1104_v31 = vmul.f32 %v1079_v25, %v988_v17  ;;  %v1103_v34 = vmul.f32 %v1071_v24, %v987_v30  ;;  %v1072_v35 = vsel %vm1007_vm1, %v1068_v16, %v1070_v32  ;;  %v1080_v36 = vsel %vm1007_vm1, %v1070_v32, %v1068_v16 }
 0x1a8   : > { %v1105_v41 = vmul.f32 %v1072_v35, %v989_v26  ;;  %v1106_v42 = vmul.f32 %v1080_v36, %v990_v27  ;;  %v1045_v32 = vadd.f32 %v1041_v20, %v1037_v23 }
 0x1a9   : > { %v1108_v40 = vadd.f32 %v1104_v31, %v1100_v28  ;;  %v1082_v43 = vpop.permute.xlu0 %1081  ;;  %v1107_v54 = vadd.f32 %v1103_v34, %v1099_v44  ;;  %v2346_v44 = vld [vmem:[#allocation3 + $0xd4] ss:$24 sps:$4 sm:$0xff]  }
 0x1aa   : > { %v1091_v46 = vsel %vm1028_vm2, %v1088_v15, %v1082_v43  ;;  %v1097_v47 = vsel %vm1028_vm2, %v1082_v43, %v1088_v15  ;;  %v1084_v53 = vpop.permute.xlu1 %1083  ;;  %v1109_v55 = vadd.f32 %v1105_v41, %v1101_v45  ;;  %v1110_v58 = vadd.f32 %v1106_v42, %v1102_v50  ;;  %v2341_v43 = vld [vmem:[#allocation3 + $0x100] ss:$24 sps:$4 sm:$0xff]   ;;  %v2344_v45 = vld [vmem:[#allocation3 + $0xd0] ss:$24 sps:$4 sm:$0xff]   ;;  %v2355_v50 = vld [vmem:[#allocation3 + $0x44] ss:$24 sps:$4 sm:$0xff]  }
 0x1ab   : > { %v1111_v51 = vmul.f32 %v1097_v47, %v991_v37  ;;  %v1112_v52 = vmul.f32 %v1091_v46, %v992_v38  ;;  %v1092_v56 = vsel %vm1028_vm2, %v1090_v21, %v1084_v53  ;;  %v1098_v57 = vsel %vm1028_vm2, %v1084_v53, %v1090_v21  ;;  %v2349_v46 = vld [vmem:[#allocation3 + $0xa4] ss:$24 sps:$4 sm:$0xff]   ;;  %v2347_v47 = vld [vmem:[#allocation3 + $0xa0] ss:$24 sps:$4 sm:$0xff]   ;;  %v2356_v53 = vld [vmem:[#allocation3 + $0x10] ss:$24 sps:$4 sm:$0xff]  }
 0x1ac   : > { %v1113_v60 = vmul.f32 %v1098_v57, %v993_v48  ;;  %v1114_v61 = vmul.f32 %v1092_v56, %v994_v49  ;;  %v1040_v15 = vmul.f32 %v986_v33, %v2693_v12  ;;  %v1039_v12 = vmul.f32 %v985_v29, %v2691_v11  ;;  %v2335_v11 = vld [vmem:[#allocation3 + $0x160] ss:$24 sps:$4 sm:$0xff]   ;;  %v2337_v29 = vld [vmem:[#allocation3 + $0x164] ss:$24 sps:$4 sm:$0xff]   ;;  %v2364_v56 = vld [vmem:[#allocation3 + $0x2b4] ss:$24 sps:$4 sm:$0xff]  }
 0x1ad   : > { %v1116_v59 = vadd.f32 %v1112_v52, %v1108_v40  ;;  %v1019_v62 = vpop.permute.xlu0 %1018  ;;  %v1115_v63 = vadd.f32 %v1111_v51, %v1107_v54  ;;  %940 = vmatprep.subr.bf16.mxu0 %v2337_v29  ;;  %v2353_v51 = vld [vmem:[#allocation3 + $0x40] ss:$24 sps:$4 sm:$0xff]   ;;  %v2358_v52 = vld [vmem:[#allocation3 + $0x14] ss:$24 sps:$4 sm:$0xff]   ;;  %v2361_v54 = vld [vmem:[#allocation3 + $0x2e4] ss:$24 sps:$4 sm:$0xff]  }
 0x1ae   : > { %v1117_v0 = vadd.f32 %v1113_v60, %v1109_v55  ;;  %v1118_v3 = vadd.f32 %v1114_v61, %v1110_v58  ;;  %v1006_v4 = vpop.permute.xlu1 %1005  ;;  %941 = vmatpush1.bf16.msra.mxu0 %v2335_v11  ;;  %v2359_v55 = vld [vmem:[#allocation3 + $0x2e0] ss:$24 sps:$4 sm:$0xff]   ;;  %v2362_v57 = vld [vmem:[#allocation3 + $0x2b0] ss:$24 sps:$4 sm:$0xff]   ;;  %v2367_v58 = vld [vmem:[#allocation3 + $0x284] ss:$24 sps:$4 sm:$0xff]  }
 0x1af   : > { %v2370_v60 = vld [vmem:[#allocation3 + $0x254] ss:$24 sps:$4 sm:$0xff]   ;;  %v2368_v61 = vld [vmem:[#allocation3 + $0x250] ss:$24 sps:$4 sm:$0xff]  }
 0x1b0   : > { %v2748_v7 = vpack.c.bf16 %v1117_v0, %v1115_v63  ;;  %v2750_v8 = vpack.c.bf16 %v1118_v3, %v1116_v59  ;;  %v2365_v59 = vld [vmem:[#allocation3 + $0x280] ss:$24 sps:$4 sm:$0xff]   ;;  %v2376_v0 = vld [vmem:[#allocation3 + $0x1f4] ss:$24 sps:$4 sm:$0xff]   ;;  %v2374_v3 = vld [vmem:[#allocation3 + $0x1f0] ss:$24 sps:$4 sm:$0xff]  }
 0x1b1   : > { %v1004_v6 = vpop.permute.xlu0 %1003  ;;  %v2371_v63 = vld [vmem:[#allocation3 + $0x220] ss:$24 sps:$4 sm:$0xff]  }
 0x1b2   : > { %v1009_v10 = vsel %vm1007_vm1, %v1004_v6, %v1006_v4  ;;  %v1017_v13 = vsel %vm1007_vm1, %v1006_v4, %v1004_v6  ;;  %v1021_v17 = vpop.permute.xlu1 %1020  ;;  %v1128_v19 = vsel %vm1123_vm3, %v2748_v7, 0  ;;  %v2379_v4 = vld [vmem:[#allocation3 + $0x1c4] ss:$24 sps:$4 sm:$0xff]   ;;  %v2382_v6 = vld [vmem:[#allocation3 + $0x194] ss:$24 sps:$4 sm:$0xff]  }
 0x1b3   : > { %v1044_v16 = vmul.f32 %v1017_v13, %v990_v27  ;;  %2130 = vmatpush3.bf16.xpose.msra.mxu1 %v1128_v19  ;;  %v1043_v21 = vmul.f32 %v1009_v10, %v989_v26  ;;  %v2380_v10 = vld [vmem:[#allocation3 + $0x190] ss:$24 sps:$4 sm:$0xff]  }
 0x1b4   : > { %2135 = vmatprep.subr.bf16.mxu1 %v2560_v9 }
 0x1b5   : > { %v1048_v14 = vadd.f32 %v1044_v16, %v1040_v15  ;;  %v1025_v18 = vpop.permute.xlu0 %1024  ;;  %v1047_v33 = vadd.f32 %v1043_v21, %v1039_v12 }
 0x1b6   : > { %v1029_v24 = vsel %vm1028_vm2, %v1025_v18, %v1019_v62  ;;  %v1035_v25 = vsel %vm1028_vm2, %v1019_v62, %v1025_v18  ;;  %v1027_v31 = vpop.permute.xlu1 %1026  ;;  %v2373_v62 = vld [vmem:[#allocation3 + $0x224] ss:$24 sps:$4 sm:$0xff]  }
 0x1b7   : > { %v1049_v27 = vmul.f32 %v1035_v25, %v991_v37  ;;  %v1050_v28 = vmul.f32 %v1029_v24, %v992_v38  ;;  %v1030_v30 = vsel %vm1028_vm2, %v1027_v31, %v1021_v17  ;;  %v1036_v26 = vsel %vm1028_vm2, %v1021_v17, %v1027_v31  ;;  %v2340_v37 = vld [vmem:[#allocation3 + $0x134] ss:$24 sps:$4 sm:$0xff]   ;;  %v2343_v38 = vld [vmem:[#allocation3 + $0x104] ss:$24 sps:$4 sm:$0xff]  }
 0x1b8   : > { %v1051_v35 = vmul.f32 %v1036_v26, %v993_v48  ;;  %v1052_v36 = vmul.f32 %v1030_v30, %v994_v49  ;;  %942 = vmatprep.subr.bf16.mxu0 %v2340_v37  ;;  %v2352_v48 = vld [vmem:[#allocation3 + $0x74] ss:$24 sps:$4 sm:$0xff]   ;;  %v2350_v49 = vld [vmem:[#allocation3 + $0x70] ss:$24 sps:$4 sm:$0xff]  }
 0x1b9   : > { %v1054_v34 = vadd.f32 %v1050_v28, %v2706_v22  ;;  %v1053_v2 = vadd.f32 %v1049_v27, %v1045_v32  ;;  %v2338_v22 = vld [vmem:[#allocation3 + $0x130] ss:$24 sps:$4 sm:$0xff]  }
 0x1ba   : > { %v1055_v39 = vadd.f32 %v1051_v35, %v1047_v33  ;;  %v1056_v40 = vadd.f32 %v1052_v36, %v1048_v14  ;;  %943 = vmatpush1.bf16.msra.mxu0 %v2338_v22 }
 0x1bb   : > { %944 = vmatprep.subr.bf16.mxu0 %v2343_v38 }
 0x1bc   : > { %v2765_v41 = vpack.c.bf16 %v1055_v39, %v1053_v2  ;;  %v2767_v42 = vpack.c.bf16 %v1056_v40, %v1054_v34 }
 0x1be   : > { %2132 = vmatmul.mubr.msk.bf16.vlgmr.msra.gmra.mxu1 %vm1123_vm3, %v2765_v41  ;;  %945 = vmatpush1.bf16.msra.mxu0 %v2341_v43 }
 0x1bf   : > { %2137 = vmatprep.mubr.msk.bf16.mxu1 %vm2561_vm0, %v2560_v9  ;;  %946 = vmatprep.subr.bf16.mxu0 %v2346_v44 }
 0x1c2   : > { %947 = vmatpush1.bf16.msra.mxu0 %v2344_v45 }
 0x1c3   : > { %948 = vmatprep.subr.bf16.mxu0 %v2349_v46 }
 0x1c6   : > { %949 = vmatpush1.bf16.msra.mxu0 %v2347_v47 }
 0x1c7   : > { %950 = vmatprep.subr.bf16.mxu0 %v2352_v48 }
 0x1ca   : > { %951 = vmatpush1.bf16.msra.mxu0 %v2350_v49 }
 0x1cb   : > { %952 = vmatprep.subr.bf16.mxu0 %v2355_v50 }
 0x1ce   : > { %953 = vmatpush1.bf16.msra.mxu0 %v2353_v51 }
 0x1cf   : > { %954 = vmatprep.subr.bf16.mxu0 %v2358_v52 }
 0x1d2   : > { %955 = vmatpush1.bf16.msra.mxu0 %v2356_v53 }
 0x1d3   : > { %956 = vmatprep.subr.bf16.mxu0 %v2361_v54 }
 0x1d6   : > { %957 = vmatpush2.bf16.msra.mxu0 %v2359_v55 }
 0x1d7   : > { %958 = vmatprep.subr.bf16.mxu0 %v2364_v56 }
 0x1da   : > { %959 = vmatpush2.bf16.msra.mxu0 %v2362_v57 }
 0x1db   : > { %960 = vmatprep.subr.bf16.mxu0 %v2367_v58 }
 0x1de   : > { %961 = vmatpush2.bf16.msra.mxu0 %v2365_v59 }
 0x1df   : > { %962 = vmatprep.subr.bf16.mxu0 %v2370_v60 }
 0x1e2   : > { %963 = vmatpush2.bf16.msra.mxu0 %v2368_v61 }
 0x1e3   : > { %964 = vmatprep.subr.bf16.mxu0 %v2373_v62 }
 0x1e6   : > { %965 = vmatpush2.bf16.msra.mxu0 %v2371_v63 }
 0x1e7   : > { %966 = vmatprep.subr.bf16.mxu0 %v2376_v0 }
 0x1ea   : > { %967 = vmatpush2.bf16.msra.mxu0 %v2374_v3 }
 0x1eb   : > { %968 = vmatprep.subr.bf16.mxu0 %v2379_v4 }
 0x1ee   : > { %969 = vmatpush2.bf16.msra.mxu0 %v2377_v5  ;;  %v1380_v5 = vsel %vm1123_vm3, %v2750_v8, 0 }
 0x1ef   : > { %970 = vmatprep.subr.bf16.mxu0 %v2382_v6 }
 0x1f2   : > { %971 = vmatpush2.bf16.msra.mxu0 %v2380_v10 }
 0x1f5   : > { %973 = vmatmul.mubr.bf16.vlgmr.msra.gmra.mxu0 %v2676_v1 }
 0x27e   : > { %v1164_v13 = vpop.f32.mrf.mxu1 }
 0x27f   : > { %v1172_v15 = vsel %vm1171_vm4, %v1164_v13, -inf }
 0x280   : > { %1173 = vmax.xlane.f32.xlu0 %v1172_v15  ;;  %v2133_v16 = vpop.f32.mrf.mxu1 }
 0x282   : > { %v1167_v17 = vpop.f32.mrf.mxu1 }
 0x283   : > { %v1175_v19 = vsel %vm1171_vm4, %v1167_v17, -inf }
 0x284   : > { %1176 = vmax.xlane.f32.xlu1 %v1175_v19  ;;  %v2134_v20 = vpop.f32.mrf.mxu1 }
 0x295   : > { %1245 = vrot.lane.b32.xlu1 %v2748_v7, %s2562_s18 }
 0x2b5   : > { %v974_v31 = vpop.f32.mrf.mxu0 }
 0x2b7   : > { %v2780_v32 = vpop.f32.mrf.mxu0 }
 0x2b9   : > { %v978_v7 = vpop.f32.mrf.mxu0 }
 0x2ba   : > { %v1121_v30 = vpack.c.bf16 %v978_v7, %v974_v31 }
 0x2bb   : > { %v980_v6 = vpop.f32.mrf.mxu0 }
 0x2bc   : > { %2136 = vmatpush3.bf16.msra.mxu1 %v1121_v30  ;;  %v2810_v10 = vpack.c.bf16 %v980_v6, %v2780_v32  ;;  %v2386_v6 = vld [vmem:[%s3002_s2 + $0x60] ss:$8 sps:$4 sm:$0xff]  }
 0x2bd   : > { %2141 = vmatprep.subr.bf16.mxu1 %v2560_v9 }
 0x309   : > { %v1174_v21 = vpop.xlane.xlu0 %1173 }
 0x30a   : > { %v1178_v14 = vsub.f32 %v1164_v13, %v1174_v21 }
 0x30c   : > { %v1180_v18 = vmul.f32 1.442695, %v1178_v14 }
 0x30d   : > { %v1177_v23 = vpop.xlane.xlu1 %1176 }
 0x30e   : > { %2431 = vpow2.f32 %v1180_v18  ;;  %v1179_v1 = vsub.f32 %v1167_v17, %v1177_v23 }
 0x310   : > { %v1182_v24 = vmul.f32 1.442695, %v1179_v1 }
 0x311   : > { %v1246_v39 = vpop.permute.xlu1 %1245 }
 0x312   : > { %2433 = vpow2.f32 %v1182_v24  ;;  %v1251_v11 = vsel %vm1123_vm3, %v1246_v39, 0 }
 0x31b   : > { %v2432_v25 = vpop.eup %2431 }
 0x31c   : > { %v1184_v12 = vsel %vm1171_vm4, %v2432_v25, 0.0 }
 0x31d   : > { %1185 = vadd.xlane.f32.xlu0 %v1184_v12 }
 0x31f   : > { %v2434_v27 = vpop.eup %2433 }
 0x320   : > { %v1187_v28 = vsel %vm1171_vm4, %v2434_v27, 0.0 }
 0x321   : > { %1188 = vadd.xlane.f32.xlu0 %v1187_v28 }
 0x337   : > { %1242 = vrot.lane.b32.xlu0 %v2765_v41, %s2562_s18 }
 0x3a6   : > { %v1186_v26 = vpop.xlane.xlu0 %1185 }
 0x3a7   : > { %2435 = vrcp.f32 %v1186_v26 }
 0x3aa   : > { %v1189_v33 = vpop.xlane.xlu0 %1188 }
 0x3ab   : > { %2437 = vrcp.f32 %v1189_v33 }
 0x3ae   : > { %v1243_v41 = vpop.permute.xlu0 %1242 }
 0x3b4   : > { %v2436_v34 = vpop.eup %2435 }
 0x3b5   : > { %v1192_v36 = vmul.f32 %v2436_v34, %v2432_v25 }
 0x3b8   : > { %v2438_v35 = vpop.eup %2437 }
 0x3b9   : > { %v1193_v2 = vmul.f32 %v2438_v35, %v2434_v27 }
 0x3bb   : > { %v1194_v40 = vpack.c.bf16 %v1193_v2, %v1192_v36 }
 0x3bd   : > { %2138 = vmatmul.mubr.msk.bf16.vlgmr.msra.gmra.mxu1 %vm1171_vm4, %v1194_v40 }
 0x3be   : > { %2142 = vmatpush3.bf16.xpose.msra.mxu1 %v1251_v11  ;;  %2143 = vmatprep.mubr.msk.bf16.mxu1 %vm2561_vm0, %v2560_v9 }
 0x3bf   : > { %2147 = vmatprep.subr.bf16.mxu1 %v2560_v9 }
 0x3c5   : > { %2144 = vmatmul.mubr.msk.bf16.vlgmr.msra.gmra.mxu1 %vm1123_vm3, %v1243_v41 }
 0x3c6   : > { %2149 = vmatprep.mubr.msk.bf16.mxu1 %vm2561_vm0, %v2560_v9 }
 0x47d   : > { %v1232_v29 = vpop.f32.mrf.mxu1 }
 0x47e   : > { %1239 = vst.msk [vmem:[#allocation2] sm:$0xff] %vm1123_vm3, %v1232_v29 }
 0x47f   : > { %v2139_v37 = vpop.f32.mrf.mxu1 }
 0x481   : > { %v1235_v22 = vpop.f32.mrf.mxu1 }
 0x482   : > { %1240 = vst.msk [vmem:[#allocation2 + $0x10] sm:$0xff] %vm1123_vm3, %v1235_v22 }
 0x483   : > { %v2140_v38 = vpop.f32.mrf.mxu1 }
 0x485   : > { %v1287_v43 = vpop.f32.mrf.mxu1 }
 0x486   : > { %v1294_v44 = vsel %vm1171_vm4, %v1287_v43, -inf }
 0x487   : > { %1295 = vmax.xlane.f32.xlu1 %v1294_v44  ;;  %v2145_v45 = vpop.f32.mrf.mxu1 }
 0x489   : > { %v1290_v46 = vpop.f32.mrf.mxu1 }
 0x48a   : > { %v1297_v47 = vsel %vm1171_vm4, %v1290_v46, -inf }
 0x48b   : > { %1298 = vmax.xlane.f32.xlu0 %v1297_v47  ;;  %v2146_v48 = vpop.f32.mrf.mxu1 }
 0x510   : > { %v1296_v49 = vpop.xlane.xlu1 %1295 }
 0x511   : > { %v1300_v50 = vsub.f32 %v1287_v43, %v1296_v49 }
 0x513   : > { %v1302_v51 = vmul.f32 1.442695, %v1300_v50 }
 0x514   : > { %v1299_v52 = vpop.xlane.xlu0 %1298 }
 0x515   : > { %2439 = vpow2.f32 %v1302_v51  ;;  %v1301_v53 = vsub.f32 %v1290_v46, %v1299_v52 }
 0x517   : > { %v1304_v54 = vmul.f32 1.442695, %v1301_v53 }
 0x519   : > { %2441 = vpow2.f32 %v1304_v54 }
 0x522   : > { %v2440_v55 = vpop.eup %2439 }
 0x523   : > { %v1306_v56 = vsel %vm1171_vm4, %v2440_v55, 0.0 }
 0x524   : > { %1307 = vadd.xlane.f32.xlu1 %v1306_v56 }
 0x526   : > { %v2442_v57 = vpop.eup %2441 }
 0x527   : > { %v1309_v58 = vsel %vm1171_vm4, %v2442_v57, 0.0 }
 0x528   : > { %1310 = vadd.xlane.f32.xlu0 %v1309_v58 }
 0x535   : > { %1318 = vrot.lane.b32.xlu1 %v1121_v30, %s2562_s18 }
 0x539   : > { %1496 = vrot.lane.b32.xlu1 %v2750_v8, %s2562_s18 }
 0x5ad   : > { %v1308_v59 = vpop.xlane.xlu1 %1307 }
 0x5ae   : > { %2443 = vrcp.f32 %v1308_v59 }
 0x5b1   : > { %v1319_v60 = vpop.permute.xlu1 %1318  ;;  %v1311_v61 = vpop.xlane.xlu0 %1310 }
 0x5b2   : > { %2445 = vrcp.f32 %v1311_v61  ;;  %2148 = vmatpush3.bf16.msra.mxu1 %v1319_v60 }
 0x5b3   : > { %2153 = vmatprep.subr.bf16.mxu1 %v2560_v9 }
 0x5b5   : > { %v1497_v2 = vpop.permute.xlu1 %1496 }
 0x5b6   : > { %v1502_v40 = vsel %vm1123_vm3, %v1497_v2, 0  ;;  %v2430_v2 = vld [vmem:[%s3002_s2 + $0x84] ss:$8 sps:$4 sm:$0xff]  }
 0x5bb   : > { %v2444_v62 = vpop.eup %2443 }
 0x5bc   : > { %v1314_v0 = vmul.f32 %v2444_v62, %v2440_v55 }
 0x5bf   : > { %v2446_v63 = vpop.eup %2445 }
 0x5c0   : > { %v1315_v3 = vmul.f32 %v2446_v63, %v2442_v57 }
 0x5c2   : > { %v1316_v4 = vpack.c.bf16 %v1315_v3, %v1314_v0  ;;  %v2383_v3 = vld [vmem:[%s3002_s2 + $0x70] ss:$8 sps:$4 sm:$0xff]  }
 0x5c4   : > { %2150 = vmatmul.mubr.msk.bf16.vlgmr.msra.gmra.mxu1 %vm1171_vm4, %v1316_v4  ;;  %v2385_v4 = vld [vmem:[%s3002_s2 + $0x74] ss:$8 sps:$4 sm:$0xff]  }
 0x5c5   : > { %2154 = vmatpush3.bf16.xpose.msra.mxu1 %v1380_v5  ;;  %2155 = vmatprep.mubr.msk.bf16.mxu1 %vm2561_vm0, %v2560_v9  ;;  %v2388_v5 = vld [vmem:[%s3002_s2 + $0x64] ss:$8 sps:$4 sm:$0xff]  }
 0x5c6   : > { %2159 = vmatprep.subr.bf16.mxu1 %v2560_v9  ;;  %1824 = vmatprep.subr.bf16.mxu0 %v2385_v4 }
 0x5c7   : > { %1825 = vmatpush1.bf16.msra.mxu0 %v2383_v3 }
 0x5c8   : > { %1826 = vmatprep.subr.bf16.mxu0 %v2388_v5 }
 0x5cb   : > { %1827 = vmatpush1.bf16.msra.mxu0 %v2386_v6 }
 0x5cc   : > { %2156 = vmatmul.mubr.msk.bf16.vlgmr.msra.gmra.mxu1 %vm1123_vm3, %v2767_v42 }
 0x5cd   : > { %2160 = vmatpush3.bf16.msra.mxu1 %v2810_v10  ;;  %2161 = vmatprep.mubr.msk.bf16.mxu1 %vm2561_vm0, %v2560_v9 }
 0x5ce   : > { %2165 = vmatprep.subr.bf16.mxu1 %v2560_v9 }
 0x684   : > { %v2818_v8 = vpop.f32.mrf.mxu1 }
 0x686   : > { %v2151_v13 = vpop.f32.mrf.mxu1 }
 0x687   : > { %v2394_v13 = vld [vmem:[%s3002_s2 + $0x44] ss:$8 sps:$4 sm:$0xff]  }
 0x688   : > { %v2820_v15 = vpop.f32.mrf.mxu1 }
 0x68a   : > { %v2152_v16 = vpop.f32.mrf.mxu1 }
 0x68b   : > { %v2392_v16 = vld [vmem:[%s3002_s2 + $0x40] ss:$8 sps:$4 sm:$0xff]  }
 0x68c   : > { %v1416_v17 = vpop.f32.mrf.mxu1 }
 0x68d   : > { %v1423_v19 = vsel %vm1171_vm4, %v1416_v17, -inf }
 0x68e   : > { %1424 = vmax.xlane.f32.xlu0 %v1423_v19  ;;  %v2157_v20 = vpop.f32.mrf.mxu1  ;;  %v2395_v19 = vld [vmem:[%s3002_s2 + $0x30] ss:$8 sps:$4 sm:$0xff]  }
 0x68f   : > { %v2400_v20 = vld [vmem:[%s3002_s2 + $0x24] ss:$8 sps:$4 sm:$0xff]  }
 0x690   : > { %v1419_v21 = vpop.f32.mrf.mxu1 }
 0x691   : > { %v1426_v14 = vsel %vm1171_vm4, %v1419_v21, -inf }
 0x692   : > { %1427 = vmax.xlane.f32.xlu0 %v1426_v14  ;;  %v2158_v18 = vpop.f32.mrf.mxu1  ;;  %v2403_v14 = vld [vmem:[%s3002_s2 + $0x14] ss:$8 sps:$4 sm:$0xff]  }
 0x693   : > { %v2401_v18 = vld [vmem:[%s3002_s2 + $0x10] ss:$8 sps:$4 sm:$0xff]  }
 0x717   : > { %v1425_v23 = vpop.xlane.xlu0 %1424 }
 0x718   : > { %v1429_v1 = vsub.f32 %v1416_v17, %v1425_v23  ;;  %v2397_v17 = vld [vmem:[%s3002_s2 + $0x34] ss:$8 sps:$4 sm:$0xff]   ;;  %v2406_v23 = vld [vmem:[%s3002_s2 + $0x4] ss:$8 sps:$4 sm:$0xff]  }
 0x71a   : > { %v1431_v24 = vmul.f32 1.442695, %v1429_v1  ;;  %v2404_v1 = vld [vmem:[%s3002_s2] ss:$8 sps:$4 sm:$0xff]  }
 0x71b   : > { %v1428_v25 = vpop.xlane.xlu0 %1427 }
 0x71c   : > { %2447 = vpow2.f32 %v1431_v24  ;;  %v1430_v12 = vsub.f32 %v1419_v21, %v1428_v25  ;;  %v2398_v21 = vld [vmem:[%s3002_s2 + $0x20] ss:$8 sps:$4 sm:$0xff]   ;;  %v2409_v24 = vld [vmem:[%s3002_s2 + $0xf4] ss:$8 sps:$4 sm:$0xff]   ;;  %v2407_v25 = vld [vmem:[%s3002_s2 + $0xf0] ss:$8 sps:$4 sm:$0xff]  }
 0x71e   : > { %v1433_v27 = vmul.f32 1.442695, %v1430_v12  ;;  %v2412_v12 = vld [vmem:[%s3002_s2 + $0xe4] ss:$8 sps:$4 sm:$0xff]  }
 0x720   : > { %2449 = vpow2.f32 %v1433_v27  ;;  %v2410_v27 = vld [vmem:[%s3002_s2 + $0xe0] ss:$8 sps:$4 sm:$0xff]  }
 0x729   : > { %v2448_v28 = vpop.eup %2447 }
 0x72a   : > { %v1435_v31 = vsel %vm1171_vm4, %v2448_v28, 0.0 }
 0x72b   : > { %1436 = vadd.xlane.f32.xlu0 %v1435_v31  ;;  %v2413_v31 = vld [vmem:[%s3002_s2 + $0xd0] ss:$8 sps:$4 sm:$0xff]  }
 0x72d   : > { %v2450_v32 = vpop.eup %2449 }
 0x72e   : > { %v1438_v7 = vsel %vm1171_vm4, %v2450_v32, 0.0 }
 0x72f   : > { %1439 = vadd.xlane.f32.xlu0 %v1438_v7  ;;  %v2416_v7 = vld [vmem:[%s3002_s2 + $0xc0] ss:$8 sps:$4 sm:$0xff]  }
 0x745   : > { %1493 = vrot.lane.b32.xlu0 %v2767_v42, %s2562_s18 }
 0x7b4   : > { %v1437_v30 = vpop.xlane.xlu0 %1436 }
 0x7b5   : > { %2451 = vrcp.f32 %v1437_v30  ;;  %v2419_v30 = vld [vmem:[%s3002_s2 + $0xb0] ss:$8 sps:$4 sm:$0xff]  }
 0x7b8   : > { %v1440_v26 = vpop.xlane.xlu0 %1439 }
 0x7b9   : > { %2453 = vrcp.f32 %v1440_v26  ;;  %v2421_v26 = vld [vmem:[%s3002_s2 + $0xb4] ss:$8 sps:$4 sm:$0xff]  }
 0x7bc   : > { %v1494_v42 = vpop.permute.xlu0 %1493 }
 0x7c2   : > { %v2452_v33 = vpop.eup %2451 }
 0x7c3   : > { %v1443_v35 = vmul.f32 %v2452_v33, %v2448_v28  ;;  %v2415_v28 = vld [vmem:[%s3002_s2 + $0xd4] ss:$8 sps:$4 sm:$0xff]   ;;  %v2422_v33 = vld [vmem:[%s3002_s2 + $0xa0] ss:$8 sps:$4 sm:$0xff]  }
 0x7c6   : > { %v2454_v34 = vpop.eup %2453 }
 0x7c7   : > { %v1444_v36 = vmul.f32 %v2454_v34, %v2450_v32  ;;  %v2418_v32 = vld [vmem:[%s3002_s2 + $0xc4] ss:$8 sps:$4 sm:$0xff]  }
 0x7c8   : > { %v2424_v34 = vld [vmem:[%s3002_s2 + $0xa4] ss:$8 sps:$4 sm:$0xff]  }
 0x7c9   : > { %v1445_v39 = vpack.c.bf16 %v1444_v36, %v1443_v35  ;;  %v2425_v35 = vld [vmem:[%s3002_s2 + $0x90] ss:$8 sps:$4 sm:$0xff]   ;;  %v2427_v36 = vld [vmem:[%s3002_s2 + $0x94] ss:$8 sps:$4 sm:$0xff]  }
 0x7cb   : > { %2162 = vmatmul.mubr.msk.bf16.vlgmr.msra.gmra.mxu1 %vm1171_vm4, %v1445_v39  ;;  %v2428_v39 = vld [vmem:[%s3002_s2 + $0x80] ss:$8 sps:$4 sm:$0xff]  }
 0x7cc   : > { %2166 = vmatpush3.bf16.xpose.msra.mxu1 %v1502_v40  ;;  %2167 = vmatprep.mubr.msk.bf16.mxu1 %vm2561_vm0, %v2560_v9 }
 0x7cd   : > { %2171 = vmatprep.subr.bf16.mxu1 %v2560_v9 }
 0x7d3   : > { %2168 = vmatmul.mubr.msk.bf16.vlgmr.msra.gmra.mxu1 %vm1123_vm3, %v1494_v42 }
 0x7d4   : > { %2173 = vmatprep.mubr.msk.bf16.mxu1 %vm2561_vm0, %v2560_v9 }
 0x88b   : > { %v1483_v11 = vpop.f32.mrf.mxu1 }
 0x88c   : > { %1490 = vst.msk [vmem:[#allocation2 + $0x8] sm:$0xff] %vm1123_vm3, %v1483_v11 }
 0x88d   : > { %v2163_v41 = vpop.f32.mrf.mxu1 }
 0x88f   : > { %v1486_v29 = vpop.f32.mrf.mxu1 }
 0x890   : > { %1491 = vst.msk [vmem:[#allocation2 + $0x18] sm:$0xff] %vm1123_vm3, %v1486_v29 }
 0x891   : > { %v2164_v37 = vpop.f32.mrf.mxu1 }
 0x893   : > { %v1538_v22 = vpop.f32.mrf.mxu1 }
 0x894   : > { %v1545_v38 = vsel %vm1171_vm4, %v1538_v22, -inf }
 0x895   : > { %1546 = vmax.xlane.f32.xlu1 %v1545_v38  ;;  %v2169_v43 = vpop.f32.mrf.mxu1 }
 0x897   : > { %v1541_v44 = vpop.f32.mrf.mxu1 }
 0x898   : > { %v1548_v45 = vsel %vm1171_vm4, %v1541_v44, -inf }
 0x899   : > { %1549 = vmax.xlane.f32.xlu0 %v1548_v45  ;;  %v2170_v46 = vpop.f32.mrf.mxu1 }
 0x91e   : > { %v1547_v47 = vpop.xlane.xlu1 %1546 }
 0x91f   : > { %v1551_v9 = vsub.f32 %v1538_v22, %v1547_v47 }
 0x921   : > { %v1553_v48 = vmul.f32 1.442695, %v1551_v9 }
 0x922   : > { %v1550_v49 = vpop.xlane.xlu0 %1549 }
 0x923   : > { %2455 = vpow2.f32 %v1553_v48  ;;  %v1552_v50 = vsub.f32 %v1541_v44, %v1550_v49 }
 0x925   : > { %v1555_v51 = vmul.f32 1.442695, %v1552_v50 }
 0x927   : > { %2457 = vpow2.f32 %v1555_v51 }
 0x930   : > { %v2456_v52 = vpop.eup %2455 }
 0x931   : > { %v1557_v53 = vsel %vm1171_vm4, %v2456_v52, 0.0 }
 0x932   : > { %1558 = vadd.xlane.f32.xlu1 %v1557_v53 }
 0x934   : > { %v2458_v54 = vpop.eup %2457 }
 0x935   : > { %v1560_v55 = vsel %vm1171_vm4, %v2458_v54, 0.0 }
 0x936   : > { %1561 = vadd.xlane.f32.xlu1 %v1560_v55 }
 0x947   : > { %1569 = vrot.lane.b32.xlu1 %v2810_v10, %s2562_s18  ;;  %v2391_v10 = vld [vmem:[%s3002_s2 + $0x54] ss:$8 sps:$4 sm:$0xff]  }
 0x948   : > { %1828 = vmatprep.subr.bf16.mxu0 %v2391_v10 }
 0x94b   : > { %1367 = vrot.lane.b32.xlu1 %v2818_v8, %s2562_s18  ;;  %v2389_v8 = vld [vmem:[%s3002_s2 + $0x50] ss:$8 sps:$4 sm:$0xff]  }
 0x94c   : > { %1829 = vmatpush1.bf16.msra.mxu0 %v2389_v8 }
 0x94d   : > { %1830 = vmatprep.subr.bf16.mxu0 %v2394_v13 }
 0x950   : > { %1831 = vmatpush1.bf16.msra.mxu0 %v2392_v16 }
 0x951   : > { %1832 = vmatprep.subr.bf16.mxu0 %v2397_v17 }
 0x954   : > { %1833 = vmatpush1.bf16.msra.mxu0 %v2395_v19 }
 0x955   : > { %1834 = vmatprep.subr.bf16.mxu0 %v2400_v20 }
 0x958   : > { %1835 = vmatpush1.bf16.msra.mxu0 %v2398_v21 }
 0x959   : > { %1836 = vmatprep.subr.bf16.mxu0 %v2403_v14 }
 0x95c   : > { %1837 = vmatpush1.bf16.msra.mxu0 %v2401_v18 }
 0x95d   : > { %1838 = vmatprep.subr.bf16.mxu0 %v2406_v23 }
 0x960   : > { %1839 = vmatpush1.bf16.msra.mxu0 %v2404_v1 }
 0x961   : > { %1840 = vmatprep.subr.bf16.mxu0 %v2409_v24 }
 0x964   : > { %1841 = vmatpush2.bf16.msra.mxu0 %v2407_v25 }
 0x965   : > { %1842 = vmatprep.subr.bf16.mxu0 %v2412_v12 }
 0x968   : > { %1843 = vmatpush2.bf16.msra.mxu0 %v2410_v27 }
 0x969   : > { %1844 = vmatprep.subr.bf16.mxu0 %v2415_v28 }
 0x96c   : > { %1845 = vmatpush2.bf16.msra.mxu0 %v2413_v31 }
 0x96d   : > { %1846 = vmatprep.subr.bf16.mxu0 %v2418_v32 }
 0x970   : > { %1847 = vmatpush2.bf16.msra.mxu0 %v2416_v7 }
 0x971   : > { %1848 = vmatprep.subr.bf16.mxu0 %v2421_v26 }
 0x974   : > { %1849 = vmatpush2.bf16.msra.mxu0 %v2419_v30 }
 0x975   : > { %1850 = vmatprep.subr.bf16.mxu0 %v2424_v34 }
 0x978   : > { %1851 = vmatpush2.bf16.msra.mxu0 %v2422_v33 }
 0x979   : > { %1852 = vmatprep.subr.bf16.mxu0 %v2427_v36 }
 0x97c   : > { %1853 = vmatpush2.bf16.msra.mxu0 %v2425_v35 }
 0x97d   : > { %1854 = vmatprep.subr.bf16.mxu0 %v2430_v2 }
 0x980   : > { %1855 = vmatpush2.bf16.msra.mxu0 %v2428_v39 }
 0x9bb   : > { %v1559_v56 = vpop.xlane.xlu1 %1558 }
 0x9bc   : > { %2459 = vrcp.f32 %v1559_v56 }
 0x9bf   : > { %v1562_v57 = vpop.xlane.xlu1 %1561 }
 0x9c0   : > { %2461 = vrcp.f32 %v1562_v57 }
 0x9c3   : > { %v1570_v58 = vpop.permute.xlu1 %1569 }
 0x9c4   : > { %2172 = vmatpush3.bf16.msra.mxu1 %v1570_v58 }
 0x9c7   : > { %v1368_v59 = vpop.permute.xlu1 %1367 }
 0x9c8   : > { %1374 = vst.msk [vmem:[#allocation2] sm:$0xff] %vm1373_vm5, %v1368_v59 }
 0x9c9   : > { %v2460_v60 = vpop.eup %2459 }
 0x9ca   : > { %v1565_v62 = vmul.f32 %v2460_v60, %v2456_v52 }
 0x9cd   : > { %v2462_v61 = vpop.eup %2461 }
 0x9ce   : > { %v1566_v63 = vmul.f32 %v2462_v61, %v2458_v54 }
 0x9cf   : > { %v1626_v45 = vld [vmem:[#allocation2] sm:$0xff] }
 0x9d0   : > { %v1567_v0 = vpack.c.bf16 %v1566_v63, %v1565_v62 }
 0x9d2   : > { %2174 = vmatmul.mubr.msk.bf16.vlgmr.msra.gmra.mxu1 %vm1171_vm4, %v1567_v0 }
 0xa92   : > { %v1609_v40 = vpop.f32.mrf.mxu1 }
 0xa93   : > { %1618 = vrot.lane.b32.xlu0 %v1609_v40, %s2562_s18 }
 0xa94   : > { %v2175_v42 = vpop.f32.mrf.mxu1 }
 0xa96   : > { %v1612_v11 = vpop.f32.mrf.mxu1 }
 0xa97   : > { %1620 = vrot.lane.b32.xlu1 %v1612_v11, %s2562_s18 }
 0xa98   : > { %v2176_v41 = vpop.f32.mrf.mxu1 }
 0xa9b   : > { %1369 = vrot.lane.b32.xlu1 %v2820_v15, %s2562_s18  ;;  %s1965_s18 = sshll.u32 %s257_s12, 5 }
 0xa9c   : > { %s259_s13 = scalar_lea.vmem [#allocation6], %s1965_s18 }
 0xa9d   : > { %s1885_s14 = sshll.u32 %s259_s13, 4  ;;  %s2953_s14 = int_to_ptr.vmem [resolvable:$true] %s1885_s14 }
 0xa9e   : > { %s2489_s26 = scalar_lea.vmem %s2953_s14, 512  ;;  %p2496_p11 = scmp.lt.s32.totalorder %s2953_s14, %s2494_s28 }
 0xa9f   : > { %p2490_p8 = scmp.ne.s32.totalorder %s2953_s14, %s2489_s26  ;;  %p2497_p12 = scmp.lt.s32.totalorder %s2495_s29, %s2489_s26 }
 0xaa1   : > { %p2491_p9 = pnand %p2490_p8, %p2639_p5  ;;  %p2498_p13 = por %p2497_p12, %p2496_p11 }
 0xaa3   : > { %p2492_p10 = pneg %p2491_p9 }
 0xaa5   : > { %p2499_p0 = pnand %p2498_p13, %p2492_p10 }
 0xb05   : > { %v1619_v29 = vpop.permute.xlu0 %1618 }
 0xb06   : > { %1624 = vst.msk [vmem:[#allocation2 + $0x8] sm:$0xff] %vm1373_vm5, %v1619_v29 }
 0xb09   : > { %v1621_v37 = vpop.permute.xlu1 %1620 }
 0xb0a   : > { %1625 = vst.msk [vmem:[#allocation2 + $0x18] sm:$0xff] %vm1373_vm5, %v1621_v37 }
 0xb0d   : > { %v1370_v22 = vpop.permute.xlu1 %1369  ;;  %v1627_v38 = vld [vmem:[#allocation2 + $0x8] sm:$0xff] }
 0xb0e   : > { %1375 = vst.msk [vmem:[#allocation2 + $0x10] sm:$0xff] %vm1373_vm5, %v1370_v22 }
 0xb11   : > { %v1629_v43 = vld [vmem:[#allocation2 + $0x18] sm:$0xff] }
 0xb12   : > { %v1631_v44 = vpack.c.bf16 %v1629_v43, %v1627_v38 }
 0xb14   : > { %1856 = vmatprep.mubr.bf16.mxu0 %v1631_v44 }
 0xb15   : > { %v1628_v46 = vld [vmem:[#allocation2 + $0x10] sm:$0xff] }
 0xb16   : > { %v1630_v47 = vpack.c.bf16 %v1628_v46, %v1626_v45 }
 0xb18   : > { %1857 = vmatmul.mubr.bf16.vlgmr.msra.gmra.mxu0 %v1630_v47 }
 0xbd8   : > { %v1858_v15 = vpop.f32.mrf.mxu0 }
 0xbd9   : > { %1867 = vst [vmem:[%s259_s13] sm:$0xff] %v1858_v15 }
 0xbda   : > { %v1860_v9 = vpop.f32.mrf.mxu0 }
 0xbdb   : > { %1868 = vst [vmem:[%s259_s13 + $0x8] sm:$0xff] %v1860_v9 }
 0xbdc   : > { %v1862_v48 = vpop.f32.mrf.mxu0 }
 0xbdd   : > { %1869 = vst [vmem:[%s259_s13 + $0x10] sm:$0xff] %v1862_v48 }
 0xbde   : > { %v1864_v49 = vpop.f32.mrf.mxu0 }
 0xbdf   : > { %1870 = vst [vmem:[%s259_s13 + $0x18] sm:$0xff] %v1864_v49 }
 0xbe0   : > { %2502 = shalt.err (!%p2499_p0)
}
 0xbe1   : > { %s2503_s9 = scalar_lea.hbm %s2958_s19, 512  ;;  %s2507_s12 = scalar_lea.hbm %s3006_s6, 1024 }
 0xbe2   : > { %p2504_p1 = scmp.ne.s32.totalorder %s2958_s19, %s2503_s9  ;;  %p2508_p4 = scmp.lt.s32.totalorder %s2958_s19, %s3006_s6 }
 0xbe3   : > { %p2509_p7 = scmp.lt.s32.totalorder %s2507_s12, %s2503_s9 }
 0xbe4   : > { %p2505_p2 = pnand %p2504_p1, %p2639_p5 }
 0xbe5   : > { %p2510_p6 = por %p2509_p7, %p2508_p4 }
 0xbe6   : > { %p2506_p3 = pneg %p2505_p2 }
 0xbe8   : > { %p2511_p8 = pnand %p2510_p6, %p2506_p3 }
 0xbea   : > { %2514 = shalt.err (!%p2511_p8)
}
 0xbeb   : > { %s2564_s15 = smov 256   ;;  %s2565_s16 = smov 16  }
 0xbec   : > { %2181 = dma.vmem_to_hbm [thread:$0]  (%p2639_p5), %s2953_s14, 512, %s2958_s19, %s2960_s20, %s2564_s15, %s2564_s15, %s2565_s16  }
 0xbed PF: > { %p2193_p9 = scmp.ge.s32.totalorder %s2553_s24, 2  ;;  %s1900_s17 = sand.u32 1, %s2541_s21  }
 0xbee   : > { %p3010_p10 = scmp.ne.s32.totalorder %s3008_s8, 0  ;;  %s1901_s26 = scalar_lea.sflag [#allocation5], %s1900_s17 }
 0xbf0   : > { %p2188_p11 = pnand %p2193_p9, %p3010_p10 }
 0xbf2   : > { %p2189_p12 = pneg %p2188_p11 }
 0xbf4   : > { %2536 = dma.done.wait (%p2189_p12), %s1901_s26, 512  }
 0xbf5   : > { %2538 = vsyncadd (%p2189_p12), %s1901_s26, 4294966784  ;;  %p17_p13 = scmp.ge.s32.totalorder %s2626_s27, 4   ;;  %s3011_s21 = smov %s2545_s22 }
 0xbf6   : > { %s3012_s22 = smov %s2549_s23  ;;  %s3013_s23 = smov %s2637_s30 }
 0xbf7   : > { %s3014_s24 = smov %s2626_s27  ;;  %19 = sbr.rel (!%p17_p13) target bundleno = 4 (0x4), region = 84 }
 0xbfc   :  { %1906 = vsyncpa [#allocation4], 1 }
 0xbfd   :  { %1908 = vsyncpa [#allocation4 + $0x1], 1 }
 0xbfe   :  { %1909 = vsyncpa [#allocation5], 1 }
 0xbff   :  { %1911 = vsyncpa [#allocation5 + $0x1], 1 }

</bundles_post_ra>
